<compile_context>
chip_gen: v7x
topology: tpu7x:2x2x1
jax: 0.10.0
libtpu: 0.0.40
codegen_flags: <defaults>
</compile_context>

<pallas_src>
import functools

import jax
import jax.numpy as jnp
from jax.experimental import pallas as pl
from jax.experimental.pallas import tpu as pltpu

_LANE = 128
_ROW_TILE = 256                          # feeds the 256x256 MXU on v6e/v7x
_VMEM_FUSED_BUDGET = 40 * 1024 * 1024    # conservative: v7x has 64 MiB / TC
_VMEM_LIMIT = 48 * 1024 * 1024
_HW_RESIDENT_BUDGET = 12 * 1024 * 1024


def _round_up(x: int, m: int) -> int:
    return ((x + m - 1) // m) * m


# ---------------- fully fused whole-stack kernel (small graphs) ------------- #

def _make_fused_kernel(num_layers: int):
    def kernel(*refs):
        a_ref, h_ref = refs[0], refs[1]
        w_refs = refs[2:2 + num_layers]
        o_ref = refs[2 + num_layers]

        a = a_ref[...]
        h = h_ref[...]
        for i, w_ref in enumerate(w_refs):
            hw = jnp.dot(h, w_ref[...], preferred_element_type=jnp.float32)
            h = jnp.dot(a, hw, preferred_element_type=jnp.float32)
            if i < num_layers - 1:
                h = jnp.maximum(h, 0.0)          # activation on hidden layers
        o_ref[...] = h.astype(o_ref.dtype)

    return kernel


def gcn_fused(a_p: jax.Array, h_p: jax.Array, w_ps) -> jax.Array:
    """Whole GCN stack in one pallas_call; everything VMEM-resident."""
    n_pad = a_p.shape[0]
    f_last = w_ps[-1].shape[1]
    num_layers = len(w_ps)

    flops = 0
    f_prev = h_p.shape[1]
    for w in w_ps:
        f_out = w.shape[1]
        flops += 2 * n_pad * f_prev * f_out + 2 * n_pad * n_pad * f_out
        f_prev = f_out
    bytes_acc = 4 * (a_p.size + h_p.size + sum(w.size for w in w_ps)
                     + n_pad * f_last)

    def full(shape):
        return pl.BlockSpec(shape, lambda i: (0, 0))

    return pl.pallas_call(
        _make_fused_kernel(num_layers),
        out_shape=jax.ShapeDtypeStruct((n_pad, f_last), jnp.float32),
        grid_spec=pltpu.PrefetchScalarGridSpec(
            num_scalar_prefetch=0,
            grid=(1,),
            in_specs=[full(a_p.shape), full(h_p.shape)]
                     + [full(w.shape) for w in w_ps],
            out_specs=full((n_pad, f_last)),
        ),
        compiler_params=pltpu.CompilerParams(
            dimension_semantics=("arbitrary",),
            vmem_limit_bytes=_VMEM_LIMIT,
        ),
        cost_estimate=pl.CostEstimate(
            flops=flops, transcendentals=0, bytes_accessed=bytes_acc),
    )(a_p, h_p, *w_ps)


# ----------------- tiled fallback (graphs too large to fuse) ---------------- #

def _feat_transform_kernel(h_ref, w_ref, o_ref):
    o_ref[...] = jnp.dot(
        h_ref[...], w_ref[...], preferred_element_type=jnp.float32
    ).astype(o_ref.dtype)


def feat_transform(h: jax.Array, w: jax.Array, *, tm: int) -> jax.Array:
    """HW = H @ W, tiled over node rows (shapes 128-aligned, tm | N)."""
    n, f_in = h.shape
    f_out = w.shape[1]
    return pl.pallas_call(
        _feat_transform_kernel,
        out_shape=jax.ShapeDtypeStruct((n, f_out), jnp.float32),
        grid_spec=pltpu.PrefetchScalarGridSpec(
            num_scalar_prefetch=0,
            grid=(n // tm,),
            in_specs=[
                pl.BlockSpec((tm, f_in), lambda i: (i, 0)),
                pl.BlockSpec((f_in, f_out), lambda i: (0, 0)),
            ],
            out_specs=pl.BlockSpec((tm, f_out), lambda i: (i, 0)),
        ),
        compiler_params=pltpu.CompilerParams(
            dimension_semantics=("parallel",),
        ),
        cost_estimate=pl.CostEstimate(
            flops=2 * n * f_in * f_out, transcendentals=0,
            bytes_accessed=4 * (n * f_in + f_in * f_out + n * f_out)),
    )(h, w)


def _aggregate_kernel(a_ref, hw_ref, o_ref, *, apply_relu, hw_resident, tk):
    k = pl.program_id(1)

    @pl.when(k == 0)
    def _():
        o_ref[...] = jnp.zeros_like(o_ref)

    if hw_resident:
        start = pl.multiple_of(k * tk, tk)
        hw_blk = hw_ref[pl.ds(start, tk), :]
    else:
        hw_blk = hw_ref[...]

    # Output block index ignores k -> VMEM-resident across the reduction, so
    # we accumulate directly into it (no acc scratch needed for f32 output).
    o_ref[...] += jnp.dot(a_ref[...], hw_blk, preferred_element_type=jnp.float32)

    if apply_relu:
        @pl.when(k == pl.num_programs(1) - 1)
        def _():
            o_ref[...] = jnp.maximum(o_ref[...], 0.0)


def aggregate(a_hat: jax.Array, hw: jax.Array, apply_relu: bool,
              *, tm: int, tk: int, hw_resident: bool) -> jax.Array:
    """out = act(A_hat @ HW), grid over (row tiles, reduction tiles)."""
    n = a_hat.shape[0]
    f_out = hw.shape[1]
    kernel = functools.partial(_aggregate_kernel, apply_relu=apply_relu,
                               hw_resident=hw_resident, tk=tk)
    if hw_resident:
        hw_spec = pl.BlockSpec((n, f_out), lambda i, k: (0, 0))   # loaded once
        hw_reads = 1
    else:
        hw_spec = pl.BlockSpec((tk, f_out), lambda i, k: (k, 0))
        hw_reads = n // tm
    return pl.pallas_call(
        kernel,
        out_shape=jax.ShapeDtypeStruct((n, f_out), jnp.float32),
        grid_spec=pltpu.PrefetchScalarGridSpec(
            num_scalar_prefetch=0,
            grid=(n // tm, n // tk),
            in_specs=[
                pl.BlockSpec((tm, tk), lambda i, k: (i, k)),
                hw_spec,
            ],
            out_specs=pl.BlockSpec((tm, f_out), lambda i, k: (i, 0)),
        ),
        compiler_params=pltpu.CompilerParams(
            dimension_semantics=("parallel", "arbitrary"),
            vmem_limit_bytes=_VMEM_LIMIT,
        ),
        cost_estimate=pl.CostEstimate(
            flops=2 * n * n * f_out, transcendentals=0,
            bytes_accessed=4 * (n * n + hw_reads * n * f_out + n * f_out)),
    )(a_hat, hw)


# ------------------------------ model glue --------------------------------- #

def make_gcn_params(key, in_feats, n_hidden, n_classes, n_layers):
    """Glorot-uniform-ish init, mirroring GraphConv(in, out, bias=False)."""
    dims = [in_feats] + [n_hidden] * n_layers + [n_classes]
    weights = []
    for i in range(len(dims) - 1):
        key, sub = jax.random.split(key)
        fan_in, fan_out = dims[i], dims[i + 1]
        limit = jnp.sqrt(6.0 / (fan_in + fan_out))
        w = jax.random.uniform(sub, (fan_in, fan_out), jnp.float32,
                               minval=-limit, maxval=limit)
        weights.append(w)
    return weights


def normalize_adjacency(adj: jax.Array) -> jax.Array:
    """A_hat = D^{-1/2} (A + I) D^{-1/2}, degrees clamped to >= 1."""
    n = adj.shape[0]
    a = adj + jnp.eye(n, dtype=adj.dtype)
    deg = jnp.maximum(a.sum(axis=1), 1.0)
    d_inv_sqrt = 1.0 / jnp.sqrt(deg)
    return a * d_inv_sqrt[:, None] * d_inv_sqrt[None, :]


def make_gcn_forward(adj: jax.Array, weights, *, row_tile=_ROW_TILE,
                     force_tiled: bool = False):
    """Normalize + pad once (hoisted out of per-forward path); return a
    jitted forward(features).

    Zero padding is exact: padded A_hat rows/cols and padded W rows/cols are
    zero, so padded entries stay zero through every layer (incl. ReLU).
    """
    n = adj.shape[0]
    n_classes = weights[-1].shape[1]
    num_layers = len(weights)

    a_hat = normalize_adjacency(adj)
    n_pad = _round_up(n, row_tile)
    a_p = jnp.pad(a_hat, ((0, n_pad - n), (0, n_pad - n)))

    dims = [weights[0].shape[0]] + [w.shape[1] for w in weights]
    dims_p = [_round_up(d, _LANE) for d in dims]
    w_ps = [
        jnp.pad(w, ((0, dims_p[i] - dims[i]), (0, dims_p[i + 1] - dims[i + 1])))
        for i, w in enumerate(weights)
    ]

    # Decide whether the whole stack fits VMEM (double-buffered I/O + live h/hw).
    max_f = max(dims_p)
    fused_bytes = 4 * (2 * (a_p.size + n_pad * dims_p[0]
                            + sum(w.size for w in w_ps) + n_pad * dims_p[-1])
                       + 2 * n_pad * max_f)
    use_fused = (not force_tiled) and (fused_bytes <= _VMEM_FUSED_BUDGET)

    tm = min(row_tile, n_pad)
    tk = next(t for t in (2048, 1024, 512, 256, 128) if n_pad % t == 0)

    def forward(features):
        # TODO(synk): training-mode dropout (stochastic masking) not
        # implemented; eval-mode identity is used here (matches model.eval()).
        h = jnp.pad(features.astype(jnp.float32),
                    ((0, n_pad - n), (0, dims_p[0] - dims[0])))
        if use_fused:
            out = gcn_fused(a_p, h, w_ps)
        else:
            for i, w_p in enumerate(w_ps):
                hw = feat_transform(h, w_p, tm=tm)          # H @ W
                hw_resident = (hw.size * 4) <= _HW_RESIDENT_BUDGET
                h = aggregate(a_p, hw,
                              apply_relu=(i < num_layers - 1),
                              tm=tm, tk=tk, hw_resident=hw_resident)
            out = h
        return out[:n, :n_classes]

    return jax.jit(forward)


# --------------------------------- main ------------------------------------ #

if __name__ == "__main__":
    key = jax.random.PRNGKey(0)

    # Small synthetic graph / feature sizes consistent with GCN.__init__:
    N = 256          # number of graph nodes
    in_feats = 16
    n_hidden = 32
    n_classes = 4
    n_layers = 2     # -> total GraphConv layers = n_layers + 1 = 3

    key, k_adj, k_feat, k_w = jax.random.split(key, 4)

    # Random symmetric binary adjacency.
    upper = (jax.random.uniform(k_adj, (N, N)) > 0.9).astype(jnp.float32)
    adj = jnp.triu(upper, 1)
    adj = adj + adj.T

    features = jax.random.normal(k_feat, (N, in_feats), jnp.float32)
    weights = make_gcn_params(k_w, in_feats, n_hidden, n_classes, n_layers)

    # Reference in plain JAX (same math, no Pallas, no padding).
    a_hat = normalize_adjacency(adj)
    h_ref = features
    for i, w in enumerate(weights):
        h_ref = a_hat @ (h_ref @ w)
        if i < len(weights) - 1:
            h_ref = jnp.maximum(h_ref, 0.0)

    # Primary path: whole stack fused into a single pallas_call.
    fwd = make_gcn_forward(adj, weights)
    out = jax.block_until_ready(fwd(features))
    assert out.shape == (N, n_classes), out.shape
    assert bool(jnp.all(jnp.isfinite(out)))
    assert jnp.allclose(out, h_ref, atol=1e-4, rtol=1e-4)

    # Also exercise the tiled fallback path (used when the graph is too large
    # for the fully fused kernel).
    fwd_tiled = make_gcn_forward(adj, weights, force_tiled=True)
    out_tiled = jax.block_until_ready(fwd_tiled(features))
    assert jnp.allclose(out_tiled, h_ref, atol=1e-4, rtol=1e-4)

    print("KERNEL_OK")
</pallas_src>

<mosaic_0001>
module attributes {stable_mosaic.version = 11 : i64} {
  func.func @kernel(%arg0: i32, %arg1: memref<256x256xf32, #tpu.memory_space<vmem>>, %arg2: memref<256x128xf32, #tpu.memory_space<vmem>>, %arg3: memref<128x128xf32, #tpu.memory_space<vmem>>, %arg4: memref<128x128xf32, #tpu.memory_space<vmem>>, %arg5: memref<128x128xf32, #tpu.memory_space<vmem>>, %arg6: memref<256x128xf32, #tpu.memory_space<vmem>>) attributes {dimension_semantics = [#tpu.dimension_semantics<arbitrary>], iteration_bounds = array<i64: 1>, scalar_prefetch = 0 : i64, scratch_operands = 0 : i64, tpu.core_type = #tpu.core_type<tc>, window_params = [{pipeline_mode = #tpu.pipeline_mode<synchronous>, transform_indices = @transform_0, window_bounds = array<i64: 256, 256>}, {pipeline_mode = #tpu.pipeline_mode<synchronous>, transform_indices = @transform_1, window_bounds = array<i64: 256, 128>}, {pipeline_mode = #tpu.pipeline_mode<synchronous>, transform_indices = @transform_2, window_bounds = array<i64: 128, 128>}, {pipeline_mode = #tpu.pipeline_mode<synchronous>, transform_indices = @transform_3, window_bounds = array<i64: 128, 128>}, {pipeline_mode = #tpu.pipeline_mode<synchronous>, transform_indices = @transform_4, window_bounds = array<i64: 128, 128>}, {pipeline_mode = #tpu.pipeline_mode<synchronous>, transform_indices = @transform_5, window_bounds = array<i64: 256, 128>}]} {
    %c0 = arith.constant 0 : index
    %c0_0 = arith.constant 0 : index
    %0 = vector.load %arg1[%c0, %c0_0] : memref<256x256xf32, #tpu.memory_space<vmem>>, vector<256x256xf32>
    %c0_1 = arith.constant 0 : index
    %c0_2 = arith.constant 0 : index
    %1 = vector.load %arg2[%c0_1, %c0_2] : memref<256x128xf32, #tpu.memory_space<vmem>>, vector<256x128xf32>
    %c0_3 = arith.constant 0 : index
    %c0_4 = arith.constant 0 : index
    %2 = vector.load %arg3[%c0_3, %c0_4] : memref<128x128xf32, #tpu.memory_space<vmem>>, vector<128x128xf32>
    %cst = arith.constant dense<0.000000e+00> : vector<256x128xf32>
    %3 = tpu.matmul %1, %2, %cst {dimension_numbers = #tpu.dot_dimension_numbers<[1], [0], [0], [1], [0, 0, 1, 1], [], []>} : vector<256x128xf32>, vector<128x128xf32>, vector<256x128xf32> -> vector<256x128xf32>
    %cst_5 = arith.constant dense<0.000000e+00> : vector<256x128xf32>
    %4 = tpu.matmul %0, %3, %cst_5 {dimension_numbers = #tpu.dot_dimension_numbers<[1], [0], [0], [1], [0, 0, 1, 1], [], []>} : vector<256x256xf32>, vector<256x128xf32>, vector<256x128xf32> -> vector<256x128xf32>
    %cst_6 = arith.constant 0.000000e+00 : f32
    %5 = vector.broadcast %cst_6 : f32 to vector<256x128xf32>
    %6 = arith.maximumf %4, %5 : vector<256x128xf32>
    %c0_7 = arith.constant 0 : index
    %c0_8 = arith.constant 0 : index
    %7 = vector.load %arg4[%c0_7, %c0_8] : memref<128x128xf32, #tpu.memory_space<vmem>>, vector<128x128xf32>
    %cst_9 = arith.constant dense<0.000000e+00> : vector<256x128xf32>
    %8 = tpu.matmul %6, %7, %cst_9 {dimension_numbers = #tpu.dot_dimension_numbers<[1], [0], [0], [1], [0, 0, 1, 1], [], []>} : vector<256x128xf32>, vector<128x128xf32>, vector<256x128xf32> -> vector<256x128xf32>
    %cst_10 = arith.constant dense<0.000000e+00> : vector<256x128xf32>
    %9 = tpu.matmul %0, %8, %cst_10 {dimension_numbers = #tpu.dot_dimension_numbers<[1], [0], [0], [1], [0, 0, 1, 1], [], []>} : vector<256x256xf32>, vector<256x128xf32>, vector<256x128xf32> -> vector<256x128xf32>
    %cst_11 = arith.constant 0.000000e+00 : f32
    %10 = vector.broadcast %cst_11 : f32 to vector<256x128xf32>
    %11 = arith.maximumf %9, %10 : vector<256x128xf32>
    %c0_12 = arith.constant 0 : index
    %c0_13 = arith.constant 0 : index
    %12 = vector.load %arg5[%c0_12, %c0_13] : memref<128x128xf32, #tpu.memory_space<vmem>>, vector<128x128xf32>
    %cst_14 = arith.constant dense<0.000000e+00> : vector<256x128xf32>
    %13 = tpu.matmul %11, %12, %cst_14 {dimension_numbers = #tpu.dot_dimension_numbers<[1], [0], [0], [1], [0, 0, 1, 1], [], []>} : vector<256x128xf32>, vector<128x128xf32>, vector<256x128xf32> -> vector<256x128xf32>
    %cst_15 = arith.constant dense<0.000000e+00> : vector<256x128xf32>
    %14 = tpu.matmul %0, %13, %cst_15 {dimension_numbers = #tpu.dot_dimension_numbers<[1], [0], [0], [1], [0, 0, 1, 1], [], []>} : vector<256x256xf32>, vector<256x128xf32>, vector<256x128xf32> -> vector<256x128xf32>
    %c0_16 = arith.constant 0 : index
    %c0_17 = arith.constant 0 : index
    %15 = vector.load %arg6[%c0_16, %c0_17] : memref<256x128xf32, #tpu.memory_space<vmem>>, vector<256x128xf32>
    tpu.vector_store %arg6[%c0_16, %c0_17], %14 {strides = array<i32>} : memref<256x128xf32, #tpu.memory_space<vmem>>, vector<256x128xf32>,
    return
  }
  func.func @transform_0(%arg0: i32) -> (i32, i32) {
    %c0_i32 = arith.constant 0 : i32
    %c0_i32_0 = arith.constant 0 : i32
    %c0_i32_1 = arith.constant 0 : i32
    return %c0_i32, %c0_i32_0 : i32, i32
  }
  func.func @transform_1(%arg0: i32) -> (i32, i32) {
    %c0_i32 = arith.constant 0 : i32
    %c0_i32_0 = arith.constant 0 : i32
    %c0_i32_1 = arith.constant 0 : i32
    return %c0_i32, %c0_i32_0 : i32, i32
  }
  func.func @transform_2(%arg0: i32) -> (i32, i32) {
    %c0_i32 = arith.constant 0 : i32
    %c0_i32_0 = arith.constant 0 : i32
    %c0_i32_1 = arith.constant 0 : i32
    return %c0_i32, %c0_i32_0 : i32, i32
  }
  func.func @transform_3(%arg0: i32) -> (i32, i32) {
    %c0_i32 = arith.constant 0 : i32
    %c0_i32_0 = arith.constant 0 : i32
    %c0_i32_1 = arith.constant 0 : i32
    return %c0_i32, %c0_i32_0 : i32, i32
  }
  func.func @transform_4(%arg0: i32) -> (i32, i32) {
    %c0_i32 = arith.constant 0 : i32
    %c0_i32_0 = arith.constant 0 : i32
    %c0_i32_1 = arith.constant 0 : i32
    return %c0_i32, %c0_i32_0 : i32, i32
  }
  func.func @transform_5(%arg0: i32) -> (i32, i32) {
    %c0_i32 = arith.constant 0 : i32
    %c0_i32_0 = arith.constant 0 : i32
    %c0_i32_1 = arith.constant 0 : i32
    return %c0_i32, %c0_i32_0 : i32, i32
  }
}

</mosaic_0001>

<bundles_post_ra>
// kernel: forward.1
= control target key start
LH: loop header
LB: loop body
LE: loop exit
PB: predicated region body
PF: predicated region fallthrough
CT: control target
= control target key end

     0   :  { %10 = vsyncpa [#allocation3], 0  ;;  %s2377_s18 = smov [#allocation2]   ;;  %s3427_s0 = inlined_call_operand.vmem [shape: f32[256,256], index: 0, kind: input, shape index: {}]   ;;  %s3428_s1 = inlined_call_operand.vmem [shape: f32[256,128], index: 1, kind: input, shape index: {}]   ;;  %s3429_s2 = inlined_call_operand.hbm [shape: f32[128,128], index: 2, kind: input, shape index: {}]   ;;  %s3430_s3 = inlined_call_operand.vmem [shape: f32[128,128], index: 3, kind: input, shape index: {}]   ;;  %s3431_s4 = inlined_call_operand.vmem [shape: f32[128,128], index: 4, kind: input, shape index: {}]   ;;  %s3432_s5 = inlined_call_operand.vmem [shape: f32[256,128], index: 5, kind: output, shape index: {}]  }
   0x1   :  { %s20_s19 = sshll.u32 %s2377_s18, 4  ;;  %s2353_s22 = scalar_lea.hbm %s3429_s2, 2048  ;;  %s21_s19 = int_to_ptr.vmem [resolvable:$true] %s20_s19 }
   0x2   :  { %p2354_p0 = scmp.ne.s32.totalorder %s3429_s2, %s2353_s22  ;;  %p2357_p1 = scmp.lt.u32.totalorder %s2353_s22, %s3429_s2 }
   0x4   :  { %p2359_p2 = pnand %p2357_p1, %p2354_p0 }
   0x6   :  { %2362 = shalt.err (!%p2359_p2)
}
   0x7   :  { %s2363_s27 = scalar_lea.vmem %s21_s19, 2048  ;;  %p2368_p4 = scmp.lt.s32.totalorder %s21_s19, %s21_s19 }
   0x8   :  { %p2364_p3 = scmp.ne.s32.totalorder %s21_s19, %s2363_s27  ;;  %p2369_p5 = scmp.lt.s32.totalorder %s2363_s27, %s2363_s27 }
   0xa   :  { %p2370_p6 = por %p2369_p5, %p2368_p4 }
   0xc   :  { %p2371_p7 = pnand %p2370_p6, %p2364_p3 }
   0xe   :  { %2374 = shalt.err (!%p2371_p7)
}
   0xf   :  { %s2378_s28 = smov 128   ;;  %s2379_s29 = smov 8  }
  0x10   :  { %26 = dma.hbm_to_vmem [thread:$0]  %s3429_s2, 2048, %s21_s19, [#allocation3], %s2378_s28, %s2378_s28, %s2379_s29  }
  0x11   :  { %2375 = dma.done.wait [#allocation3], 2048  }
  0x12   :  { %2376 = vsyncadd [#allocation3], 4294965248  ;;  %v130_v0 = vld [vmem:[#allocation2] sm:$0xff]  ;;  %v131_v1 = vld [vmem:[#allocation2 + $0x8] sm:$0xff]  ;;  %v3433_v56 = vmov 0.0|0.0  }
  0x13   :  { %v132_v2 = vld [vmem:[#allocation2 + $0x10] sm:$0xff]  ;;  %v2013_v3 = vpack.c.bf16 %v131_v1, %v130_v0  ;;  %v133_v4 = vld [vmem:[#allocation2 + $0x18] sm:$0xff]  ;;  %v134_v6 = vld [vmem:[#allocation2 + $0x20] sm:$0xff]  ;;  %2253 = vmatprep.subr.bf16.mxu1 %v3433_v56 }
  0x14   :  { %v2017_v5 = vpack.c.bf16 %v133_v4, %v132_v2  ;;  %v135_v7 = vld [vmem:[#allocation2 + $0x28] sm:$0xff]  ;;  %v98_v9 = vld [vmem:[%s3428_s1] sm:$0xff]  ;;  %v136_v10 = vld [vmem:[#allocation2 + $0x30] sm:$0xff] }
  0x15   :  { %2014 = vmatprep.subr.bf16.mxu0 %v2013_v3  ;;  %v2021_v8 = vpack.c.bf16 %v135_v7, %v134_v6  ;;  %v137_v11 = vld [vmem:[#allocation2 + $0x38] sm:$0xff]  ;;  %1805 = vmatprep.mubr.f32.mxu0 %v98_v9  ;;  %v138_v13 = vld [vmem:[#allocation2 + $0x40] sm:$0xff]  ;;  %v139_v14 = vld [vmem:[#allocation2 + $0x48] sm:$0xff] }
  0x16   :  { %2016 = vmatpush3.bf16.msra.mxu0 %v2013_v3  ;;  %v2025_v12 = vpack.c.bf16 %v137_v11, %v136_v10  ;;  %v2029_v15 = vpack.c.bf16 %v139_v14, %v138_v13  ;;  %v140_v16 = vld [vmem:[#allocation2 + $0x50] sm:$0xff]  ;;  %v141_v17 = vld [vmem:[#allocation2 + $0x58] sm:$0xff]  ;;  %v142_v19 = vld [vmem:[#allocation2 + $0x60] sm:$0xff] }
  0x17   :  { %2018 = vmatprep.subr.bf16.mxu0 %v2017_v5  ;;  %v2033_v18 = vpack.c.bf16 %v141_v17, %v140_v16  ;;  %v143_v20 = vld [vmem:[#allocation2 + $0x68] sm:$0xff]  ;;  %v144_v22 = vld [vmem:[#allocation2 + $0x70] sm:$0xff]  ;;  %v145_v23 = vld [vmem:[#allocation2 + $0x78] sm:$0xff] }
  0x18   :  { %v2037_v21 = vpack.c.bf16 %v143_v20, %v142_v19  ;;  %v2041_v24 = vpack.c.bf16 %v145_v23, %v144_v22  ;;  %v99_v25 = vld [vmem:[%s3428_s1 + $0x8] sm:$0xff]  ;;  %v100_v26 = vld [vmem:[%s3428_s1 + $0x10] sm:$0xff]  ;;  %v101_v27 = vld [vmem:[%s3428_s1 + $0x18] sm:$0xff] }
  0x19   :  { %v102_v28 = vld [vmem:[%s3428_s1 + $0x20] sm:$0xff]  ;;  %v103_v29 = vld [vmem:[%s3428_s1 + $0x28] sm:$0xff]  ;;  %v104_v30 = vld [vmem:[%s3428_s1 + $0x30] sm:$0xff] }
  0x1a   :  { %2020 = vmatpush3.bf16.msra.mxu0 %v2017_v5  ;;  %v105_v31 = vld [vmem:[%s3428_s1 + $0x38] sm:$0xff]  ;;  %v106_v32 = vld [vmem:[%s3428_s1 + $0x40] sm:$0xff]  ;;  %v107_v33 = vld [vmem:[%s3428_s1 + $0x48] sm:$0xff] }
  0x1b   :  { %2022 = vmatprep.subr.bf16.mxu0 %v2021_v8  ;;  %v108_v34 = vld [vmem:[%s3428_s1 + $0x50] sm:$0xff]  ;;  %v109_v35 = vld [vmem:[%s3428_s1 + $0x58] sm:$0xff]  ;;  %v110_v36 = vld [vmem:[%s3428_s1 + $0x60] sm:$0xff] }
  0x1c   :  { %v111_v37 = vld [vmem:[%s3428_s1 + $0x68] sm:$0xff]  ;;  %v112_v38 = vld [vmem:[%s3428_s1 + $0x70] sm:$0xff]  ;;  %v113_v39 = vld [vmem:[%s3428_s1 + $0x78] sm:$0xff] }
  0x1d   :  { %v114_v40 = vld [vmem:[%s3428_s1 + $0x80] sm:$0xff]  ;;  %v115_v41 = vld [vmem:[%s3428_s1 + $0x88] sm:$0xff]  ;;  %v116_v42 = vld [vmem:[%s3428_s1 + $0x90] sm:$0xff] }
  0x1e   :  { %2024 = vmatpush3.bf16.msra.mxu0 %v2021_v8  ;;  %v117_v43 = vld [vmem:[%s3428_s1 + $0x98] sm:$0xff]  ;;  %v118_v44 = vld [vmem:[%s3428_s1 + $0xa0] sm:$0xff]  ;;  %v119_v45 = vld [vmem:[%s3428_s1 + $0xa8] sm:$0xff] }
  0x1f   :  { %2026 = vmatprep.subr.bf16.mxu0 %v2025_v12  ;;  %v120_v46 = vld [vmem:[%s3428_s1 + $0xb0] sm:$0xff]  ;;  %v121_v47 = vld [vmem:[%s3428_s1 + $0xb8] sm:$0xff]  ;;  %v122_v48 = vld [vmem:[%s3428_s1 + $0xc0] sm:$0xff] }
  0x20   :  { %v123_v49 = vld [vmem:[%s3428_s1 + $0xc8] sm:$0xff]  ;;  %v124_v50 = vld [vmem:[%s3428_s1 + $0xd0] sm:$0xff]  ;;  %v125_v51 = vld [vmem:[%s3428_s1 + $0xd8] sm:$0xff] }
  0x21   :  { %v126_v52 = vld [vmem:[%s3428_s1 + $0xe0] sm:$0xff]  ;;  %v127_v53 = vld [vmem:[%s3428_s1 + $0xe8] sm:$0xff]  ;;  %v128_v54 = vld [vmem:[%s3428_s1 + $0xf0] sm:$0xff] }
  0x22   :  { %2028 = vmatpush3.bf16.msra.mxu0 %v2025_v12  ;;  %v129_v55 = vld [vmem:[%s3428_s1 + $0xf8] sm:$0xff]  ;;  %v2524_v57 = vld [vmem:[%s3427_s0 + $0x8] sm:$0xff] }
  0x23   :  { %2030 = vmatprep.subr.bf16.mxu0 %v2029_v15  ;;  %v59_v58 = vld [vmem:[%s3427_s0 + $0xc8] sm:$0xff] }
  0x24   :  { %495 = vmatprep.mubr.f32.mxu1 %v59_v58  ;;  %v2610_v58 = vld [vmem:[%s3427_s0 + $0xd0] sm:$0xff] }
  0x26   :  { %2032 = vmatpush3.bf16.msra.mxu0 %v2029_v15 }
  0x27   :  { %2034 = vmatprep.subr.bf16.mxu0 %v2033_v18 }
  0x2a   :  { %2036 = vmatpush3.bf16.msra.mxu0 %v2033_v18 }
  0x2b   :  { %2038 = vmatprep.subr.bf16.mxu0 %v2037_v21 }
  0x2e   :  { %2040 = vmatpush3.bf16.msra.mxu0 %v2037_v21 }
  0x2f   :  { %2042 = vmatprep.subr.bf16.mxu0 %v2041_v24 }
  0x32   :  { %2044 = vmatpush3.bf16.msra.mxu0 %v2041_v24 }
  0x33   :  { %2045 = vmatprep.subr.bf16.mxu0 %v3433_v56 }
  0x35   :  { %1806 = vmatmul.mubr.f32.vlgmr.msra.gmra.mrb[0].mxu0 %v99_v25 }
  0x36   :  { %1808 = vmatprep.mubr.f32.mxu0 %v100_v26 }
  0x39   :  { %1809 = vmatmul.mubr.f32.gmra.mrb[2].mxu0 %v101_v27 }
  0x3a   :  { %1811 = vmatprep.mubr.f32.mxu0 %v102_v28 }
  0x3d   :  { %1812 = vmatmul.mubr.f32.gmra.mrb[4].mxu0 %v103_v29 }
  0x3e   :  { %1814 = vmatprep.mubr.f32.mxu0 %v104_v30 }
  0x41   :  { %1815 = vmatmul.mubr.f32.gmra.mrb[6].mxu0 %v105_v31 }
  0x42   :  { %1817 = vmatprep.mubr.f32.mxu0 %v106_v32 }
  0x45   :  { %1818 = vmatmul.mubr.f32.gmra.mrb[8].mxu0 %v107_v33 }
  0x46   :  { %1820 = vmatprep.mubr.f32.mxu0 %v108_v34 }
  0x49   :  { %1821 = vmatmul.mubr.f32.gmra.mrb[10].mxu0 %v109_v35 }
  0x4a   :  { %1823 = vmatprep.mubr.f32.mxu0 %v110_v36 }
  0x4d   :  { %1824 = vmatmul.mubr.f32.gmra.mrb[12].mxu0 %v111_v37 }
  0x4e   :  { %1826 = vmatprep.mubr.f32.mxu0 %v112_v38 }
  0x51   :  { %1827 = vmatmul.mubr.f32.gmra.mrb[14].mxu0 %v113_v39 }
  0x52   :  { %1829 = vmatprep.mubr.f32.mxu0 %v114_v40  ;;  %v628_v40 = vld [vmem:[%s3430_s3] sm:$0xff] }
  0x55   :  { %1830 = vmatmul.mubr.f32.gmra.mrb[16].mxu0 %v115_v41  ;;  %v629_v41 = vld [vmem:[%s3430_s3 + $0x8] sm:$0xff] }
  0x56   :  { %1832 = vmatprep.mubr.f32.mxu0 %v116_v42 }
  0x59   :  { %1833 = vmatmul.mubr.f32.gmra.mrb[18].mxu0 %v117_v43 }
  0x5a   :  { %1835 = vmatprep.mubr.f32.mxu0 %v118_v44  ;;  %v2093_v44 = vpack.c.bf16 %v629_v41, %v628_v40  ;;  %v2831_v40 = vld [vmem:[%s3427_s0 + $0xa8] sm:$0xff] }
  0x5b   :  { %v2836_v41 = vld [vmem:[%s3427_s0 + $0x168] sm:$0xff] }
  0x5c   :  { %3469 = vst [vmem:[#allocation12_spill] sm:$0xff] %v2836_v41 }
  0x5d   :  { %1836 = vmatmul.mubr.f32.gmra.mrb[20].mxu0 %v119_v45 }
  0x5e   :  { %1838 = vmatprep.mubr.f32.mxu0 %v120_v46  ;;  %v630_v46 = vld [vmem:[%s3430_s3 + $0x10] sm:$0xff] }
  0x61   :  { %1839 = vmatmul.mubr.f32.gmra.mrb[22].mxu0 %v121_v47  ;;  %v631_v47 = vld [vmem:[%s3430_s3 + $0x18] sm:$0xff] }
  0x62   :  { %1841 = vmatprep.mubr.f32.mxu0 %v122_v48  ;;  %v2575_v48 = vld [vmem:[%s3427_s0] sm:$0xff] }
  0x65   :  { %1842 = vmatmul.mubr.f32.gmra.mrb[24].mxu0 %v123_v49  ;;  %v2580_v49 = vld [vmem:[%s3427_s0 + $0xc0] sm:$0xff] }
  0x66   :  { %1844 = vmatprep.mubr.f32.mxu0 %v124_v50  ;;  %v2585_v50 = vld [vmem:[%s3427_s0 + $0x18] sm:$0xff] }
  0x69   :  { %1845 = vmatmul.mubr.f32.gmra.mrb[26].mxu0 %v125_v51  ;;  %v2590_v51 = vld [vmem:[%s3427_s0 + $0xd8] sm:$0xff] }
  0x6a   :  { %1847 = vmatprep.mubr.f32.mxu0 %v126_v52  ;;  %v2097_v52 = vpack.c.bf16 %v631_v47, %v630_v46  ;;  %v2868_v46 = vld [vmem:[%s3427_s0 + $0xb0] sm:$0xff] }
  0x6b   :  { %v2874_v47 = vld [vmem:[%s3427_s0 + $0x170] sm:$0xff] }
  0x6c   :  { %3472 = vst [vmem:[#allocation15_spill] sm:$0xff] %v2874_v47 }
  0x6d   :  { %1848 = vmatmul.mubr.f32.gmra.mrb[28].mxu0 %v127_v53  ;;  %v632_v53 = vld [vmem:[%s3430_s3 + $0x20] sm:$0xff] }
  0x6e   :  { %1850 = vmatprep.mubr.f32.mxu0 %v128_v54  ;;  %v633_v54 = vld [vmem:[%s3430_s3 + $0x28] sm:$0xff] }
  0x71   :  { %1851 = vmatmul.mubr.f32.gmra.mrb[30].mxu0 %v129_v55  ;;  %v2604_v55 = vld [vmem:[%s3427_s0 + $0x10] sm:$0xff] }
  0x72   :  { %435 = vmatprep.mubr.f32.mxu0 %v2524_v57 }
 0x108   :  { %v1807_v59 = vpop.f32.mrb[0].mxu0 }
 0x109   :  { %v212_v60 = vpop.f32.mrb[1].mxu0 }
 0x10a   :  { %v2046_v61 = vpack.c.bf16 %v1807_v59, %v212_v60  ;;  %v2615_v59 = vld [vmem:[%s3427_s0 + $0x28] sm:$0xff] }
 0x10b   :  { %v2620_v60 = vld [vmem:[%s3427_s0 + $0xe8] sm:$0xff] }
 0x10c   :  { %v1810_v62 = vpop.f32.mrb[2].mxu0  ;;  %2047 = vmatpush1.bf16.msra.mxu0 %v2046_v61  ;;  %2269 = vmatpush1.bf16.msra.mxu1 %v2046_v61  ;;  %v2101_v61 = vpack.c.bf16 %v633_v54, %v632_v53  ;;  %v2887_v53 = vld [vmem:[%s3427_s0 + $0x180] sm:$0xff]  ;;  %v2892_v54 = vld [vmem:[%s3427_s0 + $0x198] sm:$0xff] }
 0x10d   :  { %v222_v63 = vpop.f32.mrb[3].mxu0  ;;  %2048 = vmatprep.subr.bf16.mxu0 %v3433_v56  ;;  %2254 = vmatprep.subr.bf16.mxu1 %v3433_v56  ;;  %3474 = vst [vmem:[#allocation17_spill] sm:$0xff] %v2887_v53  ;;  %3475 = vst [vmem:[#allocation18_spill] sm:$0xff] %v2892_v54 }
 0x10e   :  { %v2049_v0 = vpack.c.bf16 %v1810_v62, %v222_v63  ;;  %v634_v62 = vld [vmem:[%s3430_s3 + $0x30] sm:$0xff]  ;;  %v635_v63 = vld [vmem:[%s3430_s3 + $0x38] sm:$0xff] }
 0x110   :  { %v1813_v1 = vpop.f32.mrb[4].mxu0  ;;  %2050 = vmatpush1.bf16.msra.mxu0 %v2049_v0  ;;  %2270 = vmatpush1.bf16.msra.mxu1 %v2049_v0  ;;  %v2634_v0 = vld [vmem:[%s3427_s0 + $0x20] sm:$0xff] }
 0x111   :  { %v232_v2 = vpop.f32.mrb[5].mxu0  ;;  %2051 = vmatprep.subr.bf16.mxu0 %v3433_v56  ;;  %2255 = vmatprep.subr.bf16.mxu1 %v3433_v56 }
 0x112   :  { %v2052_v3 = vpack.c.bf16 %v1813_v1, %v232_v2  ;;  %v2640_v1 = vld [vmem:[%s3427_s0 + $0xe0] sm:$0xff]  ;;  %v2645_v2 = vld [vmem:[%s3427_s0 + $0x38] sm:$0xff] }
 0x114   :  { %v1816_v4 = vpop.f32.mrb[6].mxu0  ;;  %2053 = vmatpush1.bf16.msra.mxu0 %v2052_v3  ;;  %2271 = vmatpush1.bf16.msra.mxu1 %v2052_v3  ;;  %v2650_v3 = vld [vmem:[%s3427_s0 + $0xf8] sm:$0xff] }
 0x115   :  { %v242_v5 = vpop.f32.mrb[7].mxu0  ;;  %2054 = vmatprep.subr.bf16.mxu0 %v3433_v56  ;;  %2256 = vmatprep.subr.bf16.mxu1 %v3433_v56 }
 0x116   :  { %v2055_v6 = vpack.c.bf16 %v1816_v4, %v242_v5  ;;  %v2105_v4 = vpack.c.bf16 %v635_v63, %v634_v62  ;;  %v636_v5 = vld [vmem:[%s3430_s3 + $0x40] sm:$0xff]  ;;  %v2904_v62 = vld [vmem:[%s3427_s0 + $0x1a8] sm:$0xff] }
 0x117   :  { %3477 = vst [vmem:[#allocation20_spill] sm:$0xff] %v2904_v62  ;;  %v2911_v63 = vld [vmem:[%s3427_s0 + $0x1a0] sm:$0xff] }
 0x118   :  { %v1819_v7 = vpop.f32.mrb[8].mxu0  ;;  %2056 = vmatpush1.bf16.msra.mxu0 %v2055_v6  ;;  %2272 = vmatpush1.bf16.msra.mxu1 %v2055_v6  ;;  %v637_v6 = vld [vmem:[%s3430_s3 + $0x48] sm:$0xff]  ;;  %3478 = vst [vmem:[#allocation21_spill] sm:$0xff] %v2911_v63 }
 0x119   :  { %v252_v8 = vpop.f32.mrb[9].mxu0  ;;  %2057 = vmatprep.subr.bf16.mxu0 %v3433_v56  ;;  %2257 = vmatprep.subr.bf16.mxu1 %v3433_v56 }
 0x11a   :  { %v2058_v9 = vpack.c.bf16 %v1819_v7, %v252_v8  ;;  %v2664_v7 = vld [vmem:[%s3427_s0 + $0x30] sm:$0xff] }
 0x11b   :  { %v2670_v8 = vld [vmem:[%s3427_s0 + $0xf0] sm:$0xff] }
 0x11c   :  { %v1822_v10 = vpop.f32.mrb[10].mxu0  ;;  %2059 = vmatpush1.bf16.msra.mxu0 %v2058_v9  ;;  %2273 = vmatpush1.bf16.msra.mxu1 %v2058_v9  ;;  %v2675_v9 = vld [vmem:[%s3427_s0 + $0x48] sm:$0xff] }
 0x11d   :  { %v262_v11 = vpop.f32.mrb[11].mxu0  ;;  %2060 = vmatprep.subr.bf16.mxu0 %v3433_v56  ;;  %2258 = vmatprep.subr.bf16.mxu1 %v3433_v56 }
 0x11e   :  { %v2061_v12 = vpack.c.bf16 %v1822_v10, %v262_v11  ;;  %v2680_v10 = vld [vmem:[%s3427_s0 + $0x108] sm:$0xff]  ;;  %v2109_v11 = vpack.c.bf16 %v637_v6, %v636_v5  ;;  %v2923_v5 = vld [vmem:[%s3427_s0 + $0x1b0] sm:$0xff] }
 0x11f   :  { %3480 = vst [vmem:[#allocation23_spill] sm:$0xff] %v2923_v5  ;;  %v2928_v6 = vld [vmem:[%s3427_s0 + $0x1c8] sm:$0xff] }
 0x120   :  { %v1825_v13 = vpop.f32.mrb[12].mxu0  ;;  %2062 = vmatpush1.bf16.msra.mxu0 %v2061_v12  ;;  %2274 = vmatpush1.bf16.msra.mxu1 %v2061_v12  ;;  %v638_v12 = vld [vmem:[%s3430_s3 + $0x50] sm:$0xff]  ;;  %3481 = vst [vmem:[#allocation24_spill] sm:$0xff] %v2928_v6 }
 0x121   :  { %v272_v14 = vpop.f32.mrb[13].mxu0  ;;  %2063 = vmatprep.subr.bf16.mxu0 %v3433_v56  ;;  %2259 = vmatprep.subr.bf16.mxu1 %v3433_v56 }
 0x122   :  { %v2064_v15 = vpack.c.bf16 %v1825_v13, %v272_v14  ;;  %v639_v13 = vld [vmem:[%s3430_s3 + $0x58] sm:$0xff]  ;;  %v2694_v14 = vld [vmem:[%s3427_s0 + $0x40] sm:$0xff] }
 0x124   :  { %v1828_v16 = vpop.f32.mrb[14].mxu0  ;;  %2065 = vmatpush1.bf16.msra.mxu0 %v2064_v15  ;;  %2275 = vmatpush1.bf16.msra.mxu1 %v2064_v15  ;;  %v2700_v15 = vld [vmem:[%s3427_s0 + $0x100] sm:$0xff] }
 0x125   :  { %v282_v17 = vpop.f32.mrb[15].mxu0  ;;  %2066 = vmatprep.subr.bf16.mxu0 %v3433_v56  ;;  %2260 = vmatprep.subr.bf16.mxu1 %v3433_v56 }
 0x126   :  { %v2067_v18 = vpack.c.bf16 %v1828_v16, %v282_v17  ;;  %v2705_v16 = vld [vmem:[%s3427_s0 + $0x58] sm:$0xff] }
 0x127   :  { %v2710_v17 = vld [vmem:[%s3427_s0 + $0x118] sm:$0xff] }
 0x128   :  { %v1831_v19 = vpop.f32.mrb[16].mxu0  ;;  %2068 = vmatpush1.bf16.msra.mxu0 %v2067_v18  ;;  %2276 = vmatpush1.bf16.msra.mxu1 %v2067_v18  ;;  %v2113_v18 = vpack.c.bf16 %v639_v13, %v638_v12  ;;  %v2940_v12 = vld [vmem:[%s3427_s0 + $0x1d8] sm:$0xff]  ;;  %v2947_v13 = vld [vmem:[%s3427_s0 + $0x1d0] sm:$0xff] }
 0x129   :  { %v292_v20 = vpop.f32.mrb[17].mxu0  ;;  %2069 = vmatprep.subr.bf16.mxu0 %v3433_v56  ;;  %2261 = vmatprep.subr.bf16.mxu1 %v3433_v56  ;;  %3483 = vst [vmem:[#allocation26_spill] sm:$0xff] %v2940_v12  ;;  %3484 = vst [vmem:[#allocation27_spill] sm:$0xff] %v2947_v13 }
 0x12a   :  { %v2070_v21 = vpack.c.bf16 %v1831_v19, %v292_v20  ;;  %v640_v19 = vld [vmem:[%s3430_s3 + $0x60] sm:$0xff]  ;;  %v641_v20 = vld [vmem:[%s3430_s3 + $0x68] sm:$0xff] }
 0x12c   :  { %v1834_v22 = vpop.f32.mrb[18].mxu0  ;;  %2071 = vmatpush1.bf16.msra.mxu0 %v2070_v21  ;;  %2277 = vmatpush1.bf16.msra.mxu1 %v2070_v21  ;;  %v2724_v21 = vld [vmem:[%s3427_s0 + $0x50] sm:$0xff] }
 0x12d   :  { %v302_v23 = vpop.f32.mrb[19].mxu0  ;;  %2072 = vmatprep.subr.bf16.mxu0 %v3433_v56  ;;  %2262 = vmatprep.subr.bf16.mxu1 %v3433_v56 }
 0x12e   :  { %v2073_v24 = vpack.c.bf16 %v1834_v22, %v302_v23  ;;  %v2730_v22 = vld [vmem:[%s3427_s0 + $0x110] sm:$0xff]  ;;  %v2735_v23 = vld [vmem:[%s3427_s0 + $0x68] sm:$0xff] }
 0x130   :  { %v1837_v25 = vpop.f32.mrb[20].mxu0  ;;  %2074 = vmatpush1.bf16.msra.mxu0 %v2073_v24  ;;  %2278 = vmatpush1.bf16.msra.mxu1 %v2073_v24  ;;  %v2740_v24 = vld [vmem:[%s3427_s0 + $0x128] sm:$0xff] }
 0x131   :  { %v312_v26 = vpop.f32.mrb[21].mxu0  ;;  %2075 = vmatprep.subr.bf16.mxu0 %v3433_v56  ;;  %2263 = vmatprep.subr.bf16.mxu1 %v3433_v56 }
 0x132   :  { %v2076_v27 = vpack.c.bf16 %v1837_v25, %v312_v26  ;;  %v2117_v25 = vpack.c.bf16 %v641_v20, %v640_v19  ;;  %v2748_v26 = vld [vmem:[%s3427_s0 + $0x60] sm:$0xff]  ;;  %v2964_v20 = vld [vmem:[%s3427_s0 + $0x1f8] sm:$0xff] }
 0x133   :  { %v2959_v19 = vld [vmem:[%s3427_s0 + $0x1e0] sm:$0xff]  ;;  %3487 = vst [vmem:[#allocation30_spill] sm:$0xff] %v2964_v20 }
 0x134   :  { %v1840_v28 = vpop.f32.mrb[22].mxu0  ;;  %2077 = vmatpush1.bf16.msra.mxu0 %v2076_v27  ;;  %2279 = vmatpush1.bf16.msra.mxu1 %v2076_v27  ;;  %v2754_v27 = vld [vmem:[%s3427_s0 + $0x120] sm:$0xff]  ;;  %3486 = vst [vmem:[#allocation29_spill] sm:$0xff] %v2959_v19 }
 0x135   :  { %v322_v29 = vpop.f32.mrb[23].mxu0  ;;  %2078 = vmatprep.subr.bf16.mxu0 %v3433_v56  ;;  %2264 = vmatprep.subr.bf16.mxu1 %v3433_v56  ;;  %3462 = vst [vmem:[#allocation5_spill] sm:$0xff] %v2754_v27 }
 0x136   :  { %v2079_v30 = vpack.c.bf16 %v1840_v28, %v322_v29  ;;  %v2759_v28 = vld [vmem:[%s3427_s0 + $0x78] sm:$0xff] }
 0x137   :  { %v2764_v29 = vld [vmem:[%s3427_s0 + $0x138] sm:$0xff] }
 0x138   :  { %v1843_v31 = vpop.f32.mrb[24].mxu0  ;;  %2080 = vmatpush1.bf16.msra.mxu0 %v2079_v30  ;;  %2280 = vmatpush1.bf16.msra.mxu1 %v2079_v30  ;;  %3463 = vst [vmem:[#allocation6_spill] sm:$0xff] %v2764_v29  ;;  %v2772_v30 = vld [vmem:[%s3427_s0 + $0x70] sm:$0xff] }
 0x139   :  { %v332_v32 = vpop.f32.mrb[25].mxu0  ;;  %2081 = vmatprep.subr.bf16.mxu0 %v3433_v56  ;;  %2265 = vmatprep.subr.bf16.mxu1 %v3433_v56 }
 0x13a   :  { %v2082_v33 = vpack.c.bf16 %v1843_v31, %v332_v32  ;;  %v2778_v31 = vld [vmem:[%s3427_s0 + $0x130] sm:$0xff]  ;;  %v2783_v32 = vld [vmem:[%s3427_s0 + $0x88] sm:$0xff] }
 0x13b   :  { %3464 = vst [vmem:[#allocation7_spill] sm:$0xff] %v2778_v31 }
 0x13c   :  { %v1846_v34 = vpop.f32.mrb[26].mxu0  ;;  %2083 = vmatpush1.bf16.msra.mxu0 %v2082_v33  ;;  %2281 = vmatpush1.bf16.msra.mxu1 %v2082_v33  ;;  %v2788_v33 = vld [vmem:[%s3427_s0 + $0x148] sm:$0xff] }
 0x13d   :  { %v342_v35 = vpop.f32.mrb[27].mxu0  ;;  %2084 = vmatprep.subr.bf16.mxu0 %v3433_v56  ;;  %2266 = vmatprep.subr.bf16.mxu1 %v3433_v56  ;;  %3465 = vst [vmem:[#allocation8_spill] sm:$0xff] %v2788_v33 }
 0x13e   :  { %v2085_v36 = vpack.c.bf16 %v1846_v34, %v342_v35  ;;  %v2796_v34 = vld [vmem:[%s3427_s0 + $0x80] sm:$0xff] }
 0x13f   :  { %v2802_v35 = vld [vmem:[%s3427_s0 + $0x140] sm:$0xff] }
 0x140   :  { %v1849_v37 = vpop.f32.mrb[28].mxu0  ;;  %2086 = vmatpush1.bf16.msra.mxu0 %v2085_v36  ;;  %2282 = vmatpush1.bf16.msra.mxu1 %v2085_v36  ;;  %3466 = vst [vmem:[#allocation9_spill] sm:$0xff] %v2802_v35  ;;  %v2807_v36 = vld [vmem:[%s3427_s0 + $0x98] sm:$0xff] }
 0x141   :  { %v352_v38 = vpop.f32.mrb[29].mxu0  ;;  %2087 = vmatprep.subr.bf16.mxu0 %v3433_v56  ;;  %2267 = vmatprep.subr.bf16.mxu1 %v3433_v56 }
 0x142   :  { %v2088_v39 = vpack.c.bf16 %v1849_v37, %v352_v38  ;;  %v2812_v37 = vld [vmem:[%s3427_s0 + $0x158] sm:$0xff]  ;;  %v2820_v38 = vld [vmem:[%s3427_s0 + $0x90] sm:$0xff] }
 0x143   :  { %3467 = vst [vmem:[#allocation10_spill] sm:$0xff] %v2812_v37 }
 0x144   :  { %v1852_v42 = vpop.f32.mrb[30].mxu0  ;;  %2089 = vmatpush1.bf16.msra.mxu0 %v2088_v39  ;;  %2283 = vmatpush1.bf16.msra.mxu1 %v2088_v39  ;;  %v2826_v39 = vld [vmem:[%s3427_s0 + $0x150] sm:$0xff] }
 0x145   :  { %v362_v43 = vpop.f32.mrb[31].mxu0  ;;  %2090 = vmatprep.subr.bf16.mxu0 %v3433_v56  ;;  %2268 = vmatprep.subr.bf16.mxu1 %v3433_v56  ;;  %3468 = vst [vmem:[#allocation11_spill] sm:$0xff] %v2826_v39  ;;  %v642_v56 = vld [vmem:[%s3430_s3 + $0x70] sm:$0xff] }
 0x146   :  { %v2091_v45 = vpack.c.bf16 %v1852_v42, %v362_v43  ;;  %v2844_v42 = vld [vmem:[%s3427_s0 + $0xa0] sm:$0xff] }
 0x147   :  { %v2850_v43 = vld [vmem:[%s3427_s0 + $0x160] sm:$0xff] }
 0x148   :  { %2092 = vmatpush1.bf16.msra.mxu0 %v2091_v45  ;;  %2284 = vmatpush1.bf16.msra.mxu1 %v2091_v45  ;;  %3470 = vst [vmem:[#allocation13_spill] sm:$0xff] %v2850_v43  ;;  %v2860_v45 = vld [vmem:[%s3427_s0 + $0x178] sm:$0xff] }
 0x149   :  { %2094 = vmatprep.subr.bf16.mxu0 %v2093_v44  ;;  %3471 = vst [vmem:[#allocation14_spill] sm:$0xff] %v2860_v45 }
 0x14b   :  { %436 = vmatmul.mubr.f32.vlgmr.msra.gmra.mrb[32].mxu0 %v2575_v48  ;;  %496 = vmatmul.mubr.f32.vlgmr.msra.gmra.mrb[0].mxu1 %v2580_v49 }
 0x14c   :  { %440 = vmatprep.mubr.f32.mxu0 %v2585_v50  ;;  %500 = vmatprep.mubr.f32.mxu1 %v2590_v51 }
 0x14d   :  { %2096 = vmatpush3.bf16.msra.mxu0 %v2093_v44  ;;  %v2855_v44 = vld [vmem:[%s3427_s0 + $0xb8] sm:$0xff] }
 0x14e   :  { %2098 = vmatprep.subr.bf16.mxu0 %v2097_v52 }
 0x14f   :  { %441 = vmatmul.mubr.f32.gmra.mrb[34].mxu0 %v2604_v55  ;;  %501 = vmatmul.mubr.f32.gmra.mrb[2].mxu1 %v2610_v58 }
 0x150   :  { %445 = vmatprep.mubr.f32.mxu0 %v2615_v59  ;;  %505 = vmatprep.mubr.f32.mxu1 %v2620_v60 }
 0x151   :  { %2100 = vmatpush3.bf16.msra.mxu0 %v2097_v52  ;;  %v2879_v52 = vld [vmem:[%s3427_s0 + $0x188] sm:$0xff] }
 0x152   :  { %2102 = vmatprep.subr.bf16.mxu0 %v2101_v61  ;;  %3473 = vst [vmem:[#allocation16_spill] sm:$0xff] %v2879_v52 }
 0x153   :  { %446 = vmatmul.mubr.f32.gmra.mrb[36].mxu0 %v2634_v0  ;;  %506 = vmatmul.mubr.f32.gmra.mrb[4].mxu1 %v2640_v1 }
 0x154   :  { %450 = vmatprep.mubr.f32.mxu0 %v2645_v2  ;;  %510 = vmatprep.mubr.f32.mxu1 %v2650_v3 }
 0x155   :  { %2104 = vmatpush3.bf16.msra.mxu0 %v2101_v61  ;;  %v2899_v61 = vld [vmem:[%s3427_s0 + $0x190] sm:$0xff] }
 0x156   :  { %2106 = vmatprep.subr.bf16.mxu0 %v2105_v4  ;;  %3476 = vst [vmem:[#allocation19_spill] sm:$0xff] %v2899_v61 }
 0x157   :  { %451 = vmatmul.mubr.f32.gmra.mrb[38].mxu0 %v2664_v7  ;;  %511 = vmatmul.mubr.f32.gmra.mrb[6].mxu1 %v2670_v8 }
 0x158   :  { %455 = vmatprep.mubr.f32.mxu0 %v2675_v9  ;;  %515 = vmatprep.mubr.f32.mxu1 %v2680_v10 }
 0x159   :  { %2108 = vmatpush3.bf16.msra.mxu0 %v2105_v4  ;;  %v2916_v4 = vld [vmem:[%s3427_s0 + $0x1b8] sm:$0xff] }
 0x15a   :  { %2110 = vmatprep.subr.bf16.mxu0 %v2109_v11  ;;  %3479 = vst [vmem:[#allocation22_spill] sm:$0xff] %v2916_v4 }
 0x15b   :  { %456 = vmatmul.mubr.f32.gmra.mrb[40].mxu0 %v2694_v14  ;;  %516 = vmatmul.mubr.f32.gmra.mrb[8].mxu1 %v2700_v15 }
 0x15c   :  { %460 = vmatprep.mubr.f32.mxu0 %v2705_v16  ;;  %520 = vmatprep.mubr.f32.mxu1 %v2710_v17 }
 0x15d   :  { %2112 = vmatpush3.bf16.msra.mxu0 %v2109_v11  ;;  %v2935_v11 = vld [vmem:[%s3427_s0 + $0x1c0] sm:$0xff] }
 0x15e   :  { %2114 = vmatprep.subr.bf16.mxu0 %v2113_v18  ;;  %3482 = vst [vmem:[#allocation25_spill] sm:$0xff] %v2935_v11 }
 0x15f   :  { %461 = vmatmul.mubr.f32.gmra.mrb[42].mxu0 %v2724_v21  ;;  %521 = vmatmul.mubr.f32.gmra.mrb[10].mxu1 %v2730_v22 }
 0x160   :  { %465 = vmatprep.mubr.f32.mxu0 %v2735_v23  ;;  %525 = vmatprep.mubr.f32.mxu1 %v2740_v24 }
 0x161   :  { %2116 = vmatpush3.bf16.msra.mxu0 %v2113_v18  ;;  %v2952_v18 = vld [vmem:[%s3427_s0 + $0x1e8] sm:$0xff] }
 0x162   :  { %2118 = vmatprep.subr.bf16.mxu0 %v2117_v25  ;;  %3485 = vst [vmem:[#allocation28_spill] sm:$0xff] %v2952_v18 }
 0x163   :  { %466 = vmatmul.mubr.f32.gmra.mrb[44].mxu0 %v2748_v26  ;;  %526 = vmatmul.mubr.f32.gmra.mrb[12].mxu1 %v2754_v27 }
 0x164   :  { %470 = vmatprep.mubr.f32.mxu0 %v2759_v28  ;;  %530 = vmatprep.mubr.f32.mxu1 %v2764_v29 }
 0x165   :  { %2120 = vmatpush3.bf16.msra.mxu0 %v2117_v25  ;;  %v2971_v25 = vld [vmem:[%s3427_s0 + $0x1f0] sm:$0xff] }
 0x166   :  { %3488 = vst [vmem:[#allocation31_spill] sm:$0xff] %v2971_v25 }
 0x167   :  { %471 = vmatmul.mubr.f32.gmra.mrb[46].mxu0 %v2772_v30  ;;  %531 = vmatmul.mubr.f32.gmra.mrb[14].mxu1 %v2778_v31 }
 0x168   :  { %475 = vmatprep.mubr.f32.mxu0 %v2783_v32  ;;  %535 = vmatprep.mubr.f32.mxu1 %v2788_v33 }
 0x16b   :  { %476 = vmatmul.mubr.f32.gmra.mrb[48].mxu0 %v2796_v34  ;;  %536 = vmatmul.mubr.f32.gmra.mrb[16].mxu1 %v2802_v35 }
 0x16c   :  { %480 = vmatprep.mubr.f32.mxu0 %v2807_v36  ;;  %540 = vmatprep.mubr.f32.mxu1 %v2812_v37 }
 0x16f   :  { %481 = vmatmul.mubr.f32.gmra.mrb[50].mxu0 %v2820_v38  ;;  %541 = vmatmul.mubr.f32.gmra.mrb[18].mxu1 %v2826_v39 }
 0x170   :  { %485 = vmatprep.mubr.f32.mxu0 %v2831_v40  ;;  %545 = vmatprep.mubr.f32.mxu1 %v2836_v41 }
 0x173   :  { %486 = vmatmul.mubr.f32.gmra.mrb[52].mxu0 %v2844_v42  ;;  %546 = vmatmul.mubr.f32.gmra.mrb[20].mxu1 %v2850_v43 }
 0x174   :  { %490 = vmatprep.mubr.f32.mxu0 %v2855_v44  ;;  %550 = vmatprep.mubr.f32.mxu1 %v2860_v45 }
 0x177   :  { %491 = vmatmul.mubr.f32.gmra.mrb[54].mxu0 %v2868_v46  ;;  %551 = vmatmul.mubr.f32.gmra.mrb[22].mxu1 %v2874_v47 }
 0x178   :  { %555 = vmatprep.mubr.f32.mxu1 %v2879_v52 }
 0x17b   :  { %556 = vmatmul.mubr.f32.gmra.mrb[24].mxu1 %v2887_v53 }
 0x17c   :  { %560 = vmatprep.mubr.f32.mxu1 %v2892_v54 }
 0x17f   :  { %561 = vmatmul.mubr.f32.gmra.mrb[26].mxu1 %v2899_v61 }
 0x180   :  { %565 = vmatprep.mubr.f32.mxu1 %v2904_v62 }
 0x183   :  { %566 = vmatmul.mubr.f32.gmra.mrb[28].mxu1 %v2911_v63 }
 0x184   :  { %570 = vmatprep.mubr.f32.mxu1 %v2916_v4 }
 0x187   :  { %571 = vmatmul.mubr.f32.gmra.mrb[30].mxu1 %v2923_v5 }
 0x188   :  { %575 = vmatprep.mubr.f32.mxu1 %v2928_v6 }
 0x18b   :  { %576 = vmatmul.mubr.f32.gmra.mrb[32].mxu1 %v2935_v11 }
 0x18c   :  { %580 = vmatprep.mubr.f32.mxu1 %v2940_v12 }
 0x18f   :  { %581 = vmatmul.mubr.f32.gmra.mrb[34].mxu1 %v2947_v13 }
 0x190   :  { %585 = vmatprep.mubr.f32.mxu1 %v2952_v18  ;;  %v643_v18 = vld [vmem:[%s3430_s3 + $0x78] sm:$0xff] }
 0x191   :  { %v2121_v13 = vpack.c.bf16 %v643_v18, %v642_v56 }
 0x193   :  { %586 = vmatmul.mubr.f32.gmra.mrb[36].mxu1 %v2959_v19  ;;  %2122 = vmatprep.subr.bf16.mxu0 %v2121_v13  ;;  %v3489_v19 = vmov 0.0|0.0  }
 0x194   :  { %590 = vmatprep.mubr.f32.mxu1 %v2964_v20  ;;  %2124 = vmatpush3.bf16.msra.mxu0 %v2121_v13 }
 0x195   :  { %2125 = vmatprep.subr.bf16.mxu0 %v3489_v19 }
 0x197   :  { %591 = vmatmul.mubr.f32.gmra.mrb[38].mxu1 %v2971_v25 }
 0x21e   :  { %v437_v20 = vpop.f32.mrb[32].mxu0  ;;  %v2981_v12 = vpop.f32.mrb[0].mxu1 }
 0x21f   :  { %v596_v11 = vmax.f32 %v437_v20, 0.0  ;;  %v439_v6 = vpop.f32.mrb[33].mxu0  ;;  %v499_v5 = vpop.f32.mrb[1].mxu1 }
 0x221   :  { %1885 = vmatprep.mubr.f32.mxu0 %v596_v11 }
 0x222   :  { %v442_v25 = vpop.f32.mrb[34].mxu0  ;;  %v2983_v4 = vpop.f32.mrb[2].mxu1 }
 0x223   :  { %v597_v63 = vmax.f32 %v442_v25, 0.0  ;;  %v444_v62 = vpop.f32.mrb[35].mxu0  ;;  %v504_v61 = vpop.f32.mrb[3].mxu1 }
 0x225   :  { %1886 = vmatmul.mubr.f32.vlgmr.msra.gmra.mrb[56].mxu0 %v597_v63 }
 0x226   :  { %v447_v54 = vpop.f32.mrb[36].mxu0  ;;  %v2985_v56 = vpop.f32.mrb[4].mxu1 }
 0x227   :  { %v598_v13 = vmax.f32 %v447_v54, 0.0  ;;  %v449_v18 = vpop.f32.mrb[37].mxu0  ;;  %v509_v53 = vpop.f32.mrb[5].mxu1 }
 0x229   :  { %1888 = vmatprep.mubr.f32.mxu0 %v598_v13 }
 0x22a   :  { %v452_v52 = vpop.f32.mrb[38].mxu0  ;;  %v2987_v47 = vpop.f32.mrb[6].mxu1 }
 0x22b   :  { %v599_v6 = vmax.f32 %v452_v52, 0.0  ;;  %v454_v5 = vpop.f32.mrb[39].mxu0  ;;  %v514_v11 = vpop.f32.mrb[7].mxu1 }
 0x22d   :  { %1889 = vmatmul.mubr.f32.gmra.mrb[58].mxu0 %v599_v6 }
 0x22e   :  { %v457_v20 = vpop.f32.mrb[40].mxu0  ;;  %v517_v45 = vpop.f32.mrb[8].mxu1 }
 0x22f   :  { %v600_v25 = vmax.f32 %v457_v20, 0.0  ;;  %v459_v62 = vpop.f32.mrb[41].mxu0  ;;  %v519_v61 = vpop.f32.mrb[9].mxu1 }
 0x231   :  { %1891 = vmatprep.mubr.f32.mxu0 %v600_v25 }
 0x232   :  { %v462_v63 = vpop.f32.mrb[42].mxu0  ;;  %v522_v43 = vpop.f32.mrb[10].mxu1 }
 0x233   :  { %v601_v41 = vmax.f32 %v462_v63, 0.0  ;;  %v464_v54 = vpop.f32.mrb[43].mxu0  ;;  %v524_v18 = vpop.f32.mrb[11].mxu1 }
 0x235   :  { %1892 = vmatmul.mubr.f32.gmra.mrb[60].mxu0 %v601_v41 }
 0x236   :  { %v467_v53 = vpop.f32.mrb[44].mxu0  ;;  %v527_v13 = vpop.f32.mrb[12].mxu1 }
 0x237   :  { %v602_v39 = vmax.f32 %v467_v53, 0.0  ;;  %v469_v37 = vpop.f32.mrb[45].mxu0  ;;  %v529_v52 = vpop.f32.mrb[13].mxu1 }
 0x239   :  { %1894 = vmatprep.mubr.f32.mxu0 %v602_v39 }
 0x23a   :  { %v472_v5 = vpop.f32.mrb[46].mxu0  ;;  %v532_v6 = vpop.f32.mrb[14].mxu1 }
 0x23b   :  { %v603_v11 = vmax.f32 %v472_v5, 0.0  ;;  %v474_v35 = vpop.f32.mrb[47].mxu0  ;;  %v534_v20 = vpop.f32.mrb[15].mxu1 }
 0x23d   :  { %1895 = vmatmul.mubr.f32.gmra.mrb[62].mxu0 %v603_v11 }
 0x23e   :  { %v477_v62 = vpop.f32.mrb[48].mxu0  ;;  %v537_v25 = vpop.f32.mrb[16].mxu1 }
 0x23f   :  { %v604_v61 = vmax.f32 %v477_v62, 0.0  ;;  %v479_v33 = vpop.f32.mrb[49].mxu0  ;;  %v539_v63 = vpop.f32.mrb[17].mxu1 }
 0x240   :  { %v608_v33 = vmax.f32 %v2981_v12, 0.0 }
 0x241   :  { %1897 = vmatprep.mubr.f32.mxu0 %v604_v61 }
 0x242   :  { %v482_v54 = vpop.f32.mrb[50].mxu0  ;;  %v542_v41 = vpop.f32.mrb[18].mxu1 }
 0x243   :  { %v605_v18 = vmax.f32 %v482_v54, 0.0  ;;  %v484_v31 = vpop.f32.mrb[51].mxu0  ;;  %v544_v53 = vpop.f32.mrb[19].mxu1  ;;  %v610_v54 = vmax.f32 %v2985_v56, 0.0 }
 0x244   :  { %v609_v31 = vmax.f32 %v2983_v4, 0.0  ;;  %v615_v4 = vmax.f32 %v532_v6, 0.0 }
 0x245   :  { %1898 = vmatmul.mubr.f32.gmra.mrb[64].mxu0 %v605_v18  ;;  %v611_v18 = vmax.f32 %v2987_v47, 0.0 }
 0x246   :  { %v487_v37 = vpop.f32.mrb[52].mxu0  ;;  %v547_v39 = vpop.f32.mrb[20].mxu1 }
 0x247   :  { %v606_v52 = vmax.f32 %v487_v37, 0.0  ;;  %v489_v29 = vpop.f32.mrb[53].mxu0  ;;  %v549_v5 = vpop.f32.mrb[21].mxu1  ;;  %v612_v37 = vmax.f32 %v517_v45, 0.0  ;;  %v618_v47 = vmax.f32 %v547_v39, 0.0 }
 0x248   :  { %v614_v5 = vmax.f32 %v527_v13, 0.0 }
 0x249   :  { %1900 = vmatprep.mubr.f32.mxu0 %v606_v52  ;;  %v613_v52 = vmax.f32 %v522_v43, 0.0 }
 0x24a   :  { %v492_v35 = vpop.f32.mrb[54].mxu0  ;;  %v552_v11 = vpop.f32.mrb[22].mxu1 }
 0x24b   :  { %v607_v20 = vmax.f32 %v492_v35, 0.0  ;;  %v494_v27 = vpop.f32.mrb[55].mxu0  ;;  %v554_v62 = vpop.f32.mrb[23].mxu1 }
 0x24c   :  { %v616_v62 = vmax.f32 %v537_v25, 0.0 }
 0x24d   :  { %1901 = vmatmul.mubr.f32.gmra.mrb[66].mxu0 %v607_v20 }
 0x24e   :  { %1903 = vmatprep.mubr.f32.mxu0 %v608_v33  ;;  %v557_v61 = vpop.f32.mrb[24].mxu1  ;;  %v617_v33 = vmax.f32 %v542_v41, 0.0 }
 0x24f   :  { %v559_v63 = vpop.f32.mrb[25].mxu1  ;;  %v620_v43 = vmax.f32 %v557_v61, 0.0 }
 0x250   :  { %v619_v63 = vmax.f32 %v552_v11, 0.0 }
 0x251   :  { %1904 = vmatmul.mubr.f32.gmra.mrb[68].mxu0 %v609_v31 }
 0x252   :  { %1906 = vmatprep.mubr.f32.mxu0 %v610_v54  ;;  %v562_v29 = vpop.f32.mrb[26].mxu1 }
 0x253   :  { %v564_v53 = vpop.f32.mrb[27].mxu1 }
 0x255   :  { %1907 = vmatmul.mubr.f32.gmra.mrb[70].mxu0 %v611_v18  ;;  %v621_v18 = vmax.f32 %v562_v29, 0.0 }
 0x256   :  { %1909 = vmatprep.mubr.f32.mxu0 %v612_v37  ;;  %v567_v27 = vpop.f32.mrb[28].mxu1 }
 0x257   :  { %v569_v12 = vpop.f32.mrb[29].mxu1  ;;  %v622_v6 = vmax.f32 %v567_v27, 0.0 }
 0x259   :  { %1910 = vmatmul.mubr.f32.gmra.mrb[72].mxu0 %v613_v52 }
 0x25a   :  { %1912 = vmatprep.mubr.f32.mxu0 %v614_v5  ;;  %v572_v35 = vpop.f32.mrb[30].mxu1 }
 0x25b   :  { %v574_v20 = vpop.f32.mrb[31].mxu1  ;;  %v623_v37 = vmax.f32 %v572_v35, 0.0 }
 0x25d   :  { %1913 = vmatmul.mubr.f32.gmra.mrb[74].mxu0 %v615_v4 }
 0x25e   :  { %1915 = vmatprep.mubr.f32.mxu0 %v616_v62  ;;  %v577_v56 = vpop.f32.mrb[32].mxu1 }
 0x25f   :  { %v579_v31 = vpop.f32.mrb[33].mxu1  ;;  %v624_v41 = vmax.f32 %v577_v56, 0.0 }
 0x261   :  { %1916 = vmatmul.mubr.f32.gmra.mrb[76].mxu0 %v617_v33 }
 0x262   :  { %1918 = vmatprep.mubr.f32.mxu0 %v618_v47  ;;  %v582_v45 = vpop.f32.mrb[34].mxu1 }
 0x263   :  { %v584_v54 = vpop.f32.mrb[35].mxu1  ;;  %v625_v12 = vmax.f32 %v582_v45, 0.0 }
 0x265   :  { %1919 = vmatmul.mubr.f32.gmra.mrb[78].mxu0 %v619_v63 }
 0x266   :  { %1921 = vmatprep.mubr.f32.mxu0 %v620_v43  ;;  %v587_v13 = vpop.f32.mrb[36].mxu1 }
 0x267   :  { %v589_v53 = vpop.f32.mrb[37].mxu1  ;;  %v626_v39 = vmax.f32 %v587_v13, 0.0 }
 0x269   :  { %1922 = vmatmul.mubr.f32.gmra.mrb[80].mxu0 %v621_v18 }
 0x26a   :  { %1924 = vmatprep.mubr.f32.mxu0 %v622_v6  ;;  %v592_v25 = vpop.f32.mrb[38].mxu1 }
 0x26b   :  { %v594_v52 = vpop.f32.mrb[39].mxu1  ;;  %v627_v5 = vmax.f32 %v592_v25, 0.0 }
 0x26d   :  { %1925 = vmatmul.mubr.f32.gmra.mrb[82].mxu0 %v623_v37 }
 0x26e   :  { %1927 = vmatprep.mubr.f32.mxu0 %v624_v41 }
 0x271   :  { %1928 = vmatmul.mubr.f32.gmra.mrb[84].mxu0 %v625_v12 }
 0x272   :  { %1930 = vmatprep.mubr.f32.mxu0 %v626_v39 }
 0x275   :  { %1931 = vmatmul.mubr.f32.gmra.mrb[86].mxu0 %v627_v5 }
 0x276   :  { %933 = vmatprep.mubr.f32.mxu0 %v2524_v57 }
 0x2f8   :  { %v1887_v11 = vpop.f32.mrb[56].mxu0 }
 0x2f9   :  { %v710_v61 = vpop.f32.mrb[57].mxu0 }
 0x2fa   :  { %v2126_v29 = vpack.c.bf16 %v1887_v11, %v710_v61 }
 0x2fc   :  { %2127 = vmatpush1.bf16.msra.mxu0 %v2126_v29 }
 0x2fd   :  { %2128 = vmatprep.subr.bf16.mxu0 %v3489_v19 }
 0x300   :  { %v1890_v27 = vpop.f32.mrb[58].mxu0 }
 0x301   :  { %v720_v35 = vpop.f32.mrb[59].mxu0 }
 0x302   :  { %v2129_v4 = vpack.c.bf16 %v1890_v27, %v720_v35 }
 0x304   :  { %2130 = vmatpush1.bf16.msra.mxu0 %v2129_v4 }
 0x305   :  { %2131 = vmatprep.subr.bf16.mxu0 %v3489_v19 }
 0x308   :  { %v1893_v20 = vpop.f32.mrb[60].mxu0 }
 0x309   :  { %v730_v62 = vpop.f32.mrb[61].mxu0 }
 0x30a   :  { %v2132_v56 = vpack.c.bf16 %v1893_v20, %v730_v62 }
 0x30c   :  { %2133 = vmatpush1.bf16.msra.mxu0 %v2132_v56 }
 0x30d   :  { %2134 = vmatprep.subr.bf16.mxu0 %v3489_v19 }
 0x310   :  { %v1896_v33 = vpop.f32.mrb[62].mxu0 }
 0x311   :  { %v740_v57 = vpop.f32.mrb[63].mxu0 }
 0x312   :  { %v2135_v31 = vpack.c.bf16 %v1896_v33, %v740_v57 }
 0x314   :  { %2136 = vmatpush1.bf16.msra.mxu0 %v2135_v31 }
 0x315   :  { %2137 = vmatprep.subr.bf16.mxu0 %v3489_v19 }
 0x318   :  { %v1899_v47 = vpop.f32.mrb[64].mxu0 }
 0x319   :  { %v750_v45 = vpop.f32.mrb[65].mxu0 }
 0x31a   :  { %v2138_v63 = vpack.c.bf16 %v1899_v47, %v750_v45 }
 0x31c   :  { %2139 = vmatpush1.bf16.msra.mxu0 %v2138_v63 }
 0x31d   :  { %2140 = vmatprep.subr.bf16.mxu0 %v3489_v19 }
 0x320   :  { %v1902_v54 = vpop.f32.mrb[66].mxu0 }
 0x321   :  { %v760_v43 = vpop.f32.mrb[67].mxu0 }
 0x322   :  { %v2141_v13 = vpack.c.bf16 %v1902_v54, %v760_v43 }
 0x324   :  { %v1905_v18 = vpop.f32.mrb[68].mxu0  ;;  %2142 = vmatpush1.bf16.msra.mxu0 %v2141_v13 }
 0x325   :  { %v770_v53 = vpop.f32.mrb[69].mxu0  ;;  %2143 = vmatprep.subr.bf16.mxu0 %v3489_v19 }
 0x326   :  { %v2144_v6 = vpack.c.bf16 %v1905_v18, %v770_v53 }
 0x328   :  { %v1908_v25 = vpop.f32.mrb[70].mxu0  ;;  %2145 = vmatpush1.bf16.msra.mxu0 %v2144_v6  ;;  %v1126_v6 = vld [vmem:[%s3431_s4] sm:$0xff] }
 0x329   :  { %v780_v37 = vpop.f32.mrb[71].mxu0  ;;  %2146 = vmatprep.subr.bf16.mxu0 %v3489_v19 }
 0x32a   :  { %v2147_v52 = vpack.c.bf16 %v1908_v25, %v780_v37  ;;  %v1127_v25 = vld [vmem:[%s3431_s4 + $0x8] sm:$0xff]  ;;  %v1128_v37 = vld [vmem:[%s3431_s4 + $0x10] sm:$0xff] }
 0x32c   :  { %v1911_v41 = vpop.f32.mrb[72].mxu0  ;;  %2148 = vmatpush1.bf16.msra.mxu0 %v2147_v52  ;;  %v2173_v52 = vpack.c.bf16 %v1127_v25, %v1126_v6 }
 0x32d   :  { %v790_v39 = vpop.f32.mrb[73].mxu0  ;;  %2149 = vmatprep.subr.bf16.mxu0 %v3489_v19 }
 0x32e   :  { %v2150_v12 = vpack.c.bf16 %v1911_v41, %v790_v39  ;;  %v1129_v41 = vld [vmem:[%s3431_s4 + $0x18] sm:$0xff]  ;;  %2174 = vmatprep.subr.bf16.mxu1 %v2173_v52 }
 0x32f   :  { %v2177_v39 = vpack.c.bf16 %v1129_v41, %v1128_v37  ;;  %2176 = vmatpush3.bf16.msra.mxu1 %v2173_v52 }
 0x330   :  { %v1914_v5 = vpop.f32.mrb[74].mxu0  ;;  %2151 = vmatpush1.bf16.msra.mxu0 %v2150_v12  ;;  %v1130_v12 = vld [vmem:[%s3431_s4 + $0x20] sm:$0xff] }
 0x331   :  { %v800_v11 = vpop.f32.mrb[75].mxu0  ;;  %2152 = vmatprep.subr.bf16.mxu0 %v3489_v19  ;;  %2178 = vmatprep.subr.bf16.mxu1 %v2177_v39 }
 0x332   :  { %v2153_v61 = vpack.c.bf16 %v1914_v5, %v800_v11  ;;  %v1131_v5 = vld [vmem:[%s3431_s4 + $0x28] sm:$0xff] }
 0x333   :  { %v2181_v11 = vpack.c.bf16 %v1131_v5, %v1130_v12  ;;  %2180 = vmatpush3.bf16.msra.mxu1 %v2177_v39 }
 0x334   :  { %v1917_v29 = vpop.f32.mrb[76].mxu0  ;;  %2154 = vmatpush1.bf16.msra.mxu0 %v2153_v61  ;;  %v1132_v61 = vld [vmem:[%s3431_s4 + $0x30] sm:$0xff] }
 0x335   :  { %v810_v27 = vpop.f32.mrb[77].mxu0  ;;  %2155 = vmatprep.subr.bf16.mxu0 %v3489_v19  ;;  %2182 = vmatprep.subr.bf16.mxu1 %v2181_v11 }
 0x336   :  { %v2156_v35 = vpack.c.bf16 %v1917_v29, %v810_v27  ;;  %v1133_v29 = vld [vmem:[%s3431_s4 + $0x38] sm:$0xff]  ;;  %v1135_v27 = vld [vmem:[%s3431_s4 + $0x48] sm:$0xff] }
 0x337   :  { %2184 = vmatpush3.bf16.msra.mxu1 %v2181_v11 }
 0x338   :  { %v1920_v4 = vpop.f32.mrb[78].mxu0  ;;  %2157 = vmatpush1.bf16.msra.mxu0 %v2156_v35  ;;  %v1137_v35 = vld [vmem:[%s3431_s4 + $0x58] sm:$0xff] }
 0x339   :  { %v820_v20 = vpop.f32.mrb[79].mxu0  ;;  %2158 = vmatprep.subr.bf16.mxu0 %v3489_v19 }
 0x33a   :  { %v2159_v62 = vpack.c.bf16 %v1920_v4, %v820_v20  ;;  %v1139_v4 = vld [vmem:[%s3431_s4 + $0x68] sm:$0xff]  ;;  %v3514_v20 = vld [vmem:[#allocation29_spill] sm:$0xff] }
 0x33c   :  { %v1923_v56 = vpop.f32.mrb[80].mxu0  ;;  %2160 = vmatpush1.bf16.msra.mxu0 %v2159_v62  ;;  %v3515_v62 = vld [vmem:[#allocation30_spill] sm:$0xff] }
 0x33d   :  { %v830_v33 = vpop.f32.mrb[81].mxu0  ;;  %2161 = vmatprep.subr.bf16.mxu0 %v3489_v19 }
 0x33e   :  { %v2162_v57 = vpack.c.bf16 %v1923_v56, %v830_v33  ;;  %v3516_v56 = vld [vmem:[#allocation31_spill] sm:$0xff] }
 0x340   :  { %v1926_v31 = vpop.f32.mrb[82].mxu0  ;;  %2163 = vmatpush1.bf16.msra.mxu0 %v2162_v57 }
 0x341   :  { %v840_v47 = vpop.f32.mrb[83].mxu0  ;;  %2164 = vmatprep.subr.bf16.mxu0 %v3489_v19 }
 0x342   :  { %v2165_v45 = vpack.c.bf16 %v1926_v31, %v840_v47 }
 0x344   :  { %v1929_v63 = vpop.f32.mrb[84].mxu0  ;;  %2166 = vmatpush1.bf16.msra.mxu0 %v2165_v45 }
 0x345   :  { %v850_v54 = vpop.f32.mrb[85].mxu0  ;;  %2167 = vmatprep.subr.bf16.mxu0 %v3489_v19 }
 0x346   :  { %v2168_v43 = vpack.c.bf16 %v1929_v63, %v850_v54 }
 0x348   :  { %v1932_v13 = vpop.f32.mrb[86].mxu0  ;;  %2169 = vmatpush1.bf16.msra.mxu0 %v2168_v43 }
 0x349   :  { %v860_v18 = vpop.f32.mrb[87].mxu0  ;;  %2170 = vmatprep.subr.bf16.mxu0 %v3489_v19 }
 0x34a   :  { %v2171_v53 = vpack.c.bf16 %v1932_v13, %v860_v18 }
 0x34c   :  { %2172 = vmatpush1.bf16.msra.mxu0 %v2171_v53 }
 0x34f   :  { %934 = vmatmul.mubr.f32.vlgmr.msra.gmra.mrb[88].mxu0 %v2575_v48  ;;  %v2185_v48 = vpack.c.bf16 %v1133_v29, %v1132_v61 }
 0x350   :  { %938 = vmatprep.mubr.f32.mxu0 %v2585_v50  ;;  %v1134_v50 = vld [vmem:[%s3431_s4 + $0x40] sm:$0xff] }
 0x351   :  { %2186 = vmatprep.subr.bf16.mxu1 %v2185_v48 }
 0x352   :  { %2188 = vmatpush3.bf16.msra.mxu1 %v2185_v48 }
 0x353   :  { %939 = vmatmul.mubr.f32.gmra.mrb[90].mxu0 %v2604_v55  ;;  %v2189_v55 = vpack.c.bf16 %v1135_v27, %v1134_v50 }
 0x354   :  { %943 = vmatprep.mubr.f32.mxu0 %v2615_v59  ;;  %v1136_v59 = vld [vmem:[%s3431_s4 + $0x50] sm:$0xff] }
 0x355   :  { %2190 = vmatprep.subr.bf16.mxu1 %v2189_v55 }
 0x356   :  { %2192 = vmatpush3.bf16.msra.mxu1 %v2189_v55 }
 0x357   :  { %944 = vmatmul.mubr.f32.gmra.mrb[92].mxu0 %v2634_v0  ;;  %v2193_v0 = vpack.c.bf16 %v1137_v35, %v1136_v59 }
 0x358   :  { %948 = vmatprep.mubr.f32.mxu0 %v2645_v2  ;;  %v1138_v2 = vld [vmem:[%s3431_s4 + $0x60] sm:$0xff] }
 0x359   :  { %2194 = vmatprep.subr.bf16.mxu1 %v2193_v0 }
 0x35a   :  { %2196 = vmatpush3.bf16.msra.mxu1 %v2193_v0 }
 0x35b   :  { %949 = vmatmul.mubr.f32.gmra.mrb[94].mxu0 %v2664_v7  ;;  %v2197_v7 = vpack.c.bf16 %v1139_v4, %v1138_v2 }
 0x35c   :  { %953 = vmatprep.mubr.f32.mxu0 %v2675_v9  ;;  %v3077_v9 = vld [vmem:[%s3427_s0 + $0xc8] sm:$0xff] }
 0x35d   :  { %2198 = vmatprep.subr.bf16.mxu1 %v2197_v7 }
 0x35e   :  { %2200 = vmatpush3.bf16.msra.mxu1 %v2197_v7 }
 0x35f   :  { %954 = vmatmul.mubr.f32.gmra.mrb[96].mxu0 %v2694_v14  ;;  %v3496_v14 = vld [vmem:[#allocation11_spill] sm:$0xff] }
 0x360   :  { %958 = vmatprep.mubr.f32.mxu0 %v2705_v16  ;;  %v3497_v16 = vld [vmem:[#allocation12_spill] sm:$0xff] }
 0x363   :  { %959 = vmatmul.mubr.f32.gmra.mrb[98].mxu0 %v2724_v21  ;;  %v3499_v21 = vld [vmem:[#allocation14_spill] sm:$0xff] }
 0x364   :  { %963 = vmatprep.mubr.f32.mxu0 %v2735_v23  ;;  %v3501_v23 = vld [vmem:[#allocation16_spill] sm:$0xff] }
 0x367   :  { %964 = vmatmul.mubr.f32.gmra.mrb[100].mxu0 %v2748_v26  ;;  %v3503_v26 = vld [vmem:[#allocation18_spill] sm:$0xff] }
 0x368   :  { %968 = vmatprep.mubr.f32.mxu0 %v2759_v28  ;;  %v3504_v28 = vld [vmem:[#allocation19_spill] sm:$0xff] }
 0x36b   :  { %969 = vmatmul.mubr.f32.gmra.mrb[102].mxu0 %v2772_v30  ;;  %v3505_v30 = vld [vmem:[#allocation20_spill] sm:$0xff] }
 0x36c   :  { %973 = vmatprep.mubr.f32.mxu0 %v2783_v32  ;;  %v3506_v32 = vld [vmem:[#allocation21_spill] sm:$0xff] }
 0x36f   :  { %974 = vmatmul.mubr.f32.gmra.mrb[104].mxu0 %v2796_v34  ;;  %v3507_v34 = vld [vmem:[#allocation22_spill] sm:$0xff] }
 0x370   :  { %978 = vmatprep.mubr.f32.mxu0 %v2807_v36  ;;  %v3508_v36 = vld [vmem:[#allocation23_spill] sm:$0xff] }
 0x373   :  { %979 = vmatmul.mubr.f32.gmra.mrb[106].mxu0 %v2820_v38  ;;  %v3509_v38 = vld [vmem:[#allocation24_spill] sm:$0xff] }
 0x374   :  { %983 = vmatprep.mubr.f32.mxu0 %v2831_v40  ;;  %v3510_v40 = vld [vmem:[#allocation25_spill] sm:$0xff] }
 0x377   :  { %984 = vmatmul.mubr.f32.gmra.mrb[108].mxu0 %v2844_v42  ;;  %v3511_v42 = vld [vmem:[#allocation26_spill] sm:$0xff] }
 0x378   :  { %988 = vmatprep.mubr.f32.mxu0 %v2855_v44  ;;  %v3512_v44 = vld [vmem:[#allocation27_spill] sm:$0xff] }
 0x37b   :  { %989 = vmatmul.mubr.f32.gmra.mrb[110].mxu0 %v2868_v46  ;;  %v3513_v46 = vld [vmem:[#allocation28_spill] sm:$0xff] }
 0x37c   :  { %993 = vmatprep.mubr.f32.mxu0 %v3077_v9 }
 0x37f   :  { %994 = vmatmul.mubr.f32.gmra.mrb[112].mxu0 %v2580_v49  ;;  %v3490_v49 = vld [vmem:[#allocation5_spill] sm:$0xff] }
 0x380   :  { %998 = vmatprep.mubr.f32.mxu0 %v2590_v51  ;;  %v3491_v51 = vld [vmem:[#allocation6_spill] sm:$0xff] }
 0x383   :  { %999 = vmatmul.mubr.f32.gmra.mrb[114].mxu0 %v2610_v58  ;;  %v3492_v58 = vld [vmem:[#allocation7_spill] sm:$0xff] }
 0x384   :  { %1003 = vmatprep.mubr.f32.mxu0 %v2620_v60  ;;  %v3493_v60 = vld [vmem:[#allocation8_spill] sm:$0xff] }
 0x387   :  { %1004 = vmatmul.mubr.f32.gmra.mrb[116].mxu0 %v2640_v1  ;;  %v3494_v1 = vld [vmem:[#allocation9_spill] sm:$0xff] }
 0x388   :  { %1008 = vmatprep.mubr.f32.mxu0 %v2650_v3  ;;  %v3495_v3 = vld [vmem:[#allocation10_spill] sm:$0xff] }
 0x38b   :  { %1009 = vmatmul.mubr.f32.gmra.mrb[118].mxu0 %v2670_v8  ;;  %v1140_v8 = vld [vmem:[%s3431_s4 + $0x70] sm:$0xff] }
 0x38c   :  { %1013 = vmatprep.mubr.f32.mxu0 %v2680_v10  ;;  %v1141_v10 = vld [vmem:[%s3431_s4 + $0x78] sm:$0xff] }
 0x38f   :  { %1014 = vmatmul.mubr.f32.gmra.mrb[120].mxu0 %v2700_v15  ;;  %v2201_v15 = vpack.c.bf16 %v1141_v10, %v1140_v8 }
 0x390   :  { %1018 = vmatprep.mubr.f32.mxu0 %v2710_v17  ;;  %v3498_v17 = vld [vmem:[#allocation13_spill] sm:$0xff] }
 0x391   :  { %2202 = vmatprep.subr.bf16.mxu1 %v2201_v15 }
 0x392   :  { %2204 = vmatpush3.bf16.msra.mxu1 %v2201_v15 }
 0x393   :  { %1019 = vmatmul.mubr.f32.gmra.mrb[122].mxu0 %v2730_v22  ;;  %2205 = vmatprep.subr.bf16.mxu1 %v3489_v19  ;;  %v3500_v22 = vld [vmem:[#allocation15_spill] sm:$0xff] }
 0x394   :  { %1023 = vmatprep.mubr.f32.mxu0 %v2740_v24  ;;  %v3502_v24 = vld [vmem:[#allocation17_spill] sm:$0xff] }
 0x397   :  { %1024 = vmatmul.mubr.f32.gmra.mrb[124].mxu0 %v3490_v49 }
 0x398   :  { %1028 = vmatprep.mubr.f32.mxu0 %v3491_v51 }
 0x39b   :  { %1029 = vmatmul.mubr.f32.gmra.mrb[126].mxu0 %v3492_v58 }
 0x39c   :  { %1033 = vmatprep.mubr.f32.mxu0 %v3493_v60 }
 0x39f   :  { %1034 = vmatmul.mubr.f32.gmra.mrb[128].mxu0 %v3494_v1 }
 0x3a0   :  { %1038 = vmatprep.mubr.f32.mxu0 %v3495_v3 }
 0x3a3   :  { %1039 = vmatmul.mubr.f32.gmra.mrb[130].mxu0 %v3496_v14 }
 0x3a4   :  { %1043 = vmatprep.mubr.f32.mxu0 %v3497_v16 }
 0x3a7   :  { %1044 = vmatmul.mubr.f32.gmra.mrb[132].mxu0 %v3498_v17 }
 0x3a8   :  { %1048 = vmatprep.mubr.f32.mxu0 %v3499_v21 }
 0x3ab   :  { %1049 = vmatmul.mubr.f32.gmra.mrb[134].mxu0 %v3500_v22 }
 0x3ac   :  { %1053 = vmatprep.mubr.f32.mxu0 %v3501_v23 }
 0x3af   :  { %1054 = vmatmul.mubr.f32.gmra.mrb[136].mxu0 %v3502_v24 }
 0x3b0   :  { %1058 = vmatprep.mubr.f32.mxu0 %v3503_v26 }
 0x3b3   :  { %1059 = vmatmul.mubr.f32.gmra.mrb[138].mxu0 %v3504_v28 }
 0x3b4   :  { %1063 = vmatprep.mubr.f32.mxu0 %v3505_v30 }
 0x3b7   :  { %1064 = vmatmul.mubr.f32.gmra.mrb[140].mxu0 %v3506_v32 }
 0x3b8   :  { %1068 = vmatprep.mubr.f32.mxu0 %v3507_v34 }
 0x3bb   :  { %1069 = vmatmul.mubr.f32.gmra.mrb[142].mxu0 %v3508_v36 }
 0x3bc   :  { %1073 = vmatprep.mubr.f32.mxu0 %v3509_v38 }
 0x3bf   :  { %1074 = vmatmul.mubr.f32.gmra.mrb[144].mxu0 %v3510_v40 }
 0x3c0   :  { %1078 = vmatprep.mubr.f32.mxu0 %v3511_v42 }
 0x3c3   :  { %1079 = vmatmul.mubr.f32.gmra.mrb[146].mxu0 %v3512_v44 }
 0x3c4   :  { %1083 = vmatprep.mubr.f32.mxu0 %v3513_v46 }
 0x3c7   :  { %1084 = vmatmul.mubr.f32.gmra.mrb[148].mxu0 %v3514_v20 }
 0x3c8   :  { %1088 = vmatprep.mubr.f32.mxu0 %v3515_v62 }
 0x3cb   :  { %1089 = vmatmul.mubr.f32.gmra.mrb[150].mxu0 %v3516_v56 }
 0x422   :  { %v935_v33 = vpop.f32.mrb[88].mxu0 }
 0x423   :  { %v1094_v57 = vmax.f32 %v935_v33, 0.0  ;;  %v937_v31 = vpop.f32.mrb[89].mxu0 }
 0x425   :  { %1965 = vmatprep.mubr.f32.mxu1 %v1094_v57 }
 0x426   :  { %v940_v47 = vpop.f32.mrb[90].mxu0 }
 0x427   :  { %v1095_v45 = vmax.f32 %v940_v47, 0.0  ;;  %v942_v63 = vpop.f32.mrb[91].mxu0 }
 0x429   :  { %1966 = vmatmul.mubr.f32.vlgmr.msra.gmra.mrb[40].mxu1 %v1095_v45 }
 0x42a   :  { %v945_v54 = vpop.f32.mrb[92].mxu0 }
 0x42b   :  { %v1096_v43 = vmax.f32 %v945_v54, 0.0  ;;  %v947_v13 = vpop.f32.mrb[93].mxu0 }
 0x42d   :  { %1968 = vmatprep.mubr.f32.mxu1 %v1096_v43 }
 0x42e   :  { %v950_v18 = vpop.f32.mrb[94].mxu0 }
 0x42f   :  { %v1097_v53 = vmax.f32 %v950_v18, 0.0  ;;  %v952_v6 = vpop.f32.mrb[95].mxu0 }
 0x431   :  { %1969 = vmatmul.mubr.f32.gmra.mrb[42].mxu1 %v1097_v53 }
 0x432   :  { %v955_v25 = vpop.f32.mrb[96].mxu0 }
 0x433   :  { %v1098_v37 = vmax.f32 %v955_v25, 0.0  ;;  %v957_v52 = vpop.f32.mrb[97].mxu0 }
 0x435   :  { %1971 = vmatprep.mubr.f32.mxu1 %v1098_v37 }
 0x436   :  { %v960_v41 = vpop.f32.mrb[98].mxu0 }
 0x437   :  { %v1099_v39 = vmax.f32 %v960_v41, 0.0  ;;  %v962_v12 = vpop.f32.mrb[99].mxu0 }
 0x439   :  { %1972 = vmatmul.mubr.f32.gmra.mrb[44].mxu1 %v1099_v39 }
 0x43a   :  { %v965_v5 = vpop.f32.mrb[100].mxu0 }
 0x43b   :  { %v1100_v11 = vmax.f32 %v965_v5, 0.0  ;;  %v967_v61 = vpop.f32.mrb[101].mxu0 }
 0x43d   :  { %1974 = vmatprep.mubr.f32.mxu1 %v1100_v11 }
 0x43e   :  { %v970_v29 = vpop.f32.mrb[102].mxu0 }
 0x43f   :  { %v1101_v48 = vmax.f32 %v970_v29, 0.0  ;;  %v972_v50 = vpop.f32.mrb[103].mxu0 }
 0x441   :  { %1975 = vmatmul.mubr.f32.gmra.mrb[46].mxu1 %v1101_v48 }
 0x442   :  { %v975_v27 = vpop.f32.mrb[104].mxu0 }
 0x443   :  { %v1102_v55 = vmax.f32 %v975_v27, 0.0  ;;  %v977_v59 = vpop.f32.mrb[105].mxu0 }
 0x445   :  { %1977 = vmatprep.mubr.f32.mxu1 %v1102_v55 }
 0x446   :  { %v980_v35 = vpop.f32.mrb[106].mxu0 }
 0x447   :  { %v1103_v0 = vmax.f32 %v980_v35, 0.0  ;;  %v982_v2 = vpop.f32.mrb[107].mxu0 }
 0x449   :  { %1978 = vmatmul.mubr.f32.gmra.mrb[48].mxu1 %v1103_v0 }
 0x44a   :  { %v985_v4 = vpop.f32.mrb[108].mxu0 }
 0x44b   :  { %v1104_v7 = vmax.f32 %v985_v4, 0.0  ;;  %v987_v49 = vpop.f32.mrb[109].mxu0 }
 0x44d   :  { %1980 = vmatprep.mubr.f32.mxu1 %v1104_v7 }
 0x44e   :  { %v990_v51 = vpop.f32.mrb[110].mxu0 }
 0x44f   :  { %v1105_v58 = vmax.f32 %v990_v51, 0.0  ;;  %v992_v60 = vpop.f32.mrb[111].mxu0 }
 0x451   :  { %1981 = vmatmul.mubr.f32.gmra.mrb[50].mxu1 %v1105_v58  ;;  %v2290_v58 = vld [vmem:[%s3427_s0 + $0x8] sm:$0xff] }
 0x452   :  { %v995_v1 = vpop.f32.mrb[112].mxu0 }
 0x453   :  { %v1106_v3 = vmax.f32 %v995_v1, 0.0  ;;  %v997_v8 = vpop.f32.mrb[113].mxu0 }
 0x455   :  { %1983 = vmatprep.mubr.f32.mxu1 %v1106_v3 }
 0x456   :  { %v1000_v10 = vpop.f32.mrb[114].mxu0 }
 0x457   :  { %v1107_v14 = vmax.f32 %v1000_v10, 0.0  ;;  %v1002_v15 = vpop.f32.mrb[115].mxu0 }
 0x459   :  { %1984 = vmatmul.mubr.f32.gmra.mrb[52].mxu1 %v1107_v14 }
 0x45a   :  { %v1005_v16 = vpop.f32.mrb[116].mxu0 }
 0x45b   :  { %v1108_v17 = vmax.f32 %v1005_v16, 0.0  ;;  %v1007_v21 = vpop.f32.mrb[117].mxu0 }
 0x45d   :  { %1986 = vmatprep.mubr.f32.mxu1 %v1108_v17 }
 0x45e   :  { %v1010_v22 = vpop.f32.mrb[118].mxu0 }
 0x45f   :  { %v1109_v23 = vmax.f32 %v1010_v22, 0.0  ;;  %v1012_v24 = vpop.f32.mrb[119].mxu0 }
 0x461   :  { %1987 = vmatmul.mubr.f32.gmra.mrb[54].mxu1 %v1109_v23 }
 0x462   :  { %v1015_v26 = vpop.f32.mrb[120].mxu0 }
 0x463   :  { %v1110_v28 = vmax.f32 %v1015_v26, 0.0  ;;  %v1017_v30 = vpop.f32.mrb[121].mxu0 }
 0x465   :  { %1989 = vmatprep.mubr.f32.mxu1 %v1110_v28 }
 0x466   :  { %v1020_v32 = vpop.f32.mrb[122].mxu0 }
 0x467   :  { %v1111_v34 = vmax.f32 %v1020_v32, 0.0  ;;  %v1022_v36 = vpop.f32.mrb[123].mxu0 }
 0x469   :  { %1990 = vmatmul.mubr.f32.gmra.mrb[56].mxu1 %v1111_v34 }
 0x46a   :  { %v1025_v38 = vpop.f32.mrb[124].mxu0 }
 0x46b   :  { %v1112_v40 = vmax.f32 %v1025_v38, 0.0  ;;  %v1027_v42 = vpop.f32.mrb[125].mxu0 }
 0x46d   :  { %1992 = vmatprep.mubr.f32.mxu1 %v1112_v40 }
 0x46e   :  { %v1030_v44 = vpop.f32.mrb[126].mxu0 }
 0x46f   :  { %v1113_v46 = vmax.f32 %v1030_v44, 0.0  ;;  %v1032_v20 = vpop.f32.mrb[127].mxu0 }
 0x471   :  { %1993 = vmatmul.mubr.f32.gmra.mrb[58].mxu1 %v1113_v46 }
 0x472   :  { %v1035_v62 = vpop.f32.mrb[128].mxu0 }
 0x473   :  { %v1114_v56 = vmax.f32 %v1035_v62, 0.0  ;;  %v1037_v33 = vpop.f32.mrb[129].mxu0 }
 0x475   :  { %1995 = vmatprep.mubr.f32.mxu1 %v1114_v56 }
 0x476   :  { %v1040_v57 = vpop.f32.mrb[130].mxu0 }
 0x477   :  { %v1115_v31 = vmax.f32 %v1040_v57, 0.0  ;;  %v1042_v47 = vpop.f32.mrb[131].mxu0 }
 0x479   :  { %1996 = vmatmul.mubr.f32.gmra.mrb[60].mxu1 %v1115_v31 }
 0x47a   :  { %v1045_v45 = vpop.f32.mrb[132].mxu0 }
 0x47b   :  { %v1116_v63 = vmax.f32 %v1045_v45, 0.0  ;;  %v1047_v54 = vpop.f32.mrb[133].mxu0 }
 0x47d   :  { %1998 = vmatprep.mubr.f32.mxu1 %v1116_v63 }
 0x47e   :  { %v1050_v43 = vpop.f32.mrb[134].mxu0 }
 0x47f   :  { %v1117_v13 = vmax.f32 %v1050_v43, 0.0  ;;  %v1052_v18 = vpop.f32.mrb[135].mxu0 }
 0x481   :  { %1999 = vmatmul.mubr.f32.gmra.mrb[62].mxu1 %v1117_v13 }
 0x482   :  { %v1055_v53 = vpop.f32.mrb[136].mxu0 }
 0x483   :  { %v1118_v6 = vmax.f32 %v1055_v53, 0.0  ;;  %v1057_v25 = vpop.f32.mrb[137].mxu0 }
 0x485   :  { %2001 = vmatprep.mubr.f32.mxu1 %v1118_v6 }
 0x486   :  { %v1060_v37 = vpop.f32.mrb[138].mxu0 }
 0x487   :  { %v1119_v52 = vmax.f32 %v1060_v37, 0.0  ;;  %v1062_v41 = vpop.f32.mrb[139].mxu0 }
 0x489   :  { %2002 = vmatmul.mubr.f32.gmra.mrb[64].mxu1 %v1119_v52 }
 0x48a   :  { %v1065_v39 = vpop.f32.mrb[140].mxu0 }
 0x48b   :  { %v1120_v12 = vmax.f32 %v1065_v39, 0.0  ;;  %v1067_v5 = vpop.f32.mrb[141].mxu0 }
 0x48d   :  { %2004 = vmatprep.mubr.f32.mxu1 %v1120_v12 }
 0x48e   :  { %v1070_v11 = vpop.f32.mrb[142].mxu0 }
 0x48f   :  { %v1121_v61 = vmax.f32 %v1070_v11, 0.0  ;;  %v1072_v29 = vpop.f32.mrb[143].mxu0 }
 0x490   :  { %v2291_v29 = vld [vmem:[%s3427_s0] sm:$0xff] }
 0x491   :  { %2005 = vmatmul.mubr.f32.gmra.mrb[66].mxu1 %v1121_v61 }
 0x492   :  { %v1075_v48 = vpop.f32.mrb[144].mxu0 }
 0x493   :  { %v1122_v50 = vmax.f32 %v1075_v48, 0.0  ;;  %v1077_v27 = vpop.f32.mrb[145].mxu0  ;;  %v2292_v48 = vld [vmem:[%s3427_s0 + $0x18] sm:$0xff] }
 0x494   :  { %v2295_v27 = vld [vmem:[%s3427_s0 + $0x20] sm:$0xff] }
 0x495   :  { %2007 = vmatprep.mubr.f32.mxu1 %v1122_v50  ;;  %v2293_v50 = vld [vmem:[%s3427_s0 + $0x10] sm:$0xff] }
 0x496   :  { %v1080_v55 = vpop.f32.mrb[146].mxu0 }
 0x497   :  { %v1123_v59 = vmax.f32 %v1080_v55, 0.0  ;;  %v1082_v35 = vpop.f32.mrb[147].mxu0  ;;  %v2296_v55 = vld [vmem:[%s3427_s0 + $0x38] sm:$0xff] }
 0x498   :  { %v2298_v35 = vld [vmem:[%s3427_s0 + $0x48] sm:$0xff] }
 0x499   :  { %2008 = vmatmul.mubr.f32.gmra.mrb[68].mxu1 %v1123_v59  ;;  %v2297_v59 = vld [vmem:[%s3427_s0 + $0x30] sm:$0xff] }
 0x49a   :  { %v1085_v0 = vpop.f32.mrb[148].mxu0 }
 0x49b   :  { %v1124_v2 = vmax.f32 %v1085_v0, 0.0  ;;  %v1087_v4 = vpop.f32.mrb[149].mxu0  ;;  %v2299_v0 = vld [vmem:[%s3427_s0 + $0x40] sm:$0xff] }
 0x49c   :  { %v2301_v4 = vld [vmem:[%s3427_s0 + $0x50] sm:$0xff] }
 0x49d   :  { %2010 = vmatprep.mubr.f32.mxu1 %v1124_v2  ;;  %v2300_v2 = vld [vmem:[%s3427_s0 + $0x58] sm:$0xff] }
 0x49e   :  { %v1090_v7 = vpop.f32.mrb[150].mxu0 }
 0x49f   :  { %v1125_v49 = vmax.f32 %v1090_v7, 0.0  ;;  %v1092_v51 = vpop.f32.mrb[151].mxu0  ;;  %v2302_v7 = vld [vmem:[%s3427_s0 + $0x68] sm:$0xff] }
 0x4a0   :  { %v2304_v51 = vld [vmem:[%s3427_s0 + $0x78] sm:$0xff] }
 0x4a1   :  { %2011 = vmatmul.mubr.f32.gmra.mrb[70].mxu1 %v1125_v49  ;;  %v2303_v49 = vld [vmem:[%s3427_s0 + $0x60] sm:$0xff] }
 0x4a2   :  { %1431 = vmatprep.mubr.f32.mxu1 %v2290_v58  ;;  %v2305_v58 = vld [vmem:[%s3427_s0 + $0x70] sm:$0xff] }
 0x4fc   :  { %v1967_v60 = vpop.f32.mrb[40].mxu1 }
 0x4fd   :  { %v1208_v1 = vpop.f32.mrb[41].mxu1 }
 0x4fe   :  { %v2206_v3 = vpack.c.bf16 %v1967_v60, %v1208_v1  ;;  %v2306_v60 = vld [vmem:[%s3427_s0 + $0x88] sm:$0xff]  ;;  %v2307_v1 = vld [vmem:[%s3427_s0 + $0x80] sm:$0xff] }
 0x500   :  { %2207 = vmatpush1.bf16.msra.mxu1 %v2206_v3  ;;  %v2308_v3 = vld [vmem:[%s3427_s0 + $0x98] sm:$0xff] }
 0x501   :  { %2208 = vmatprep.subr.bf16.mxu1 %v3489_v19 }
 0x504   :  { %v1970_v8 = vpop.f32.mrb[42].mxu1 }
 0x505   :  { %v1218_v10 = vpop.f32.mrb[43].mxu1 }
 0x506   :  { %v2209_v14 = vpack.c.bf16 %v1970_v8, %v1218_v10  ;;  %v2309_v8 = vld [vmem:[%s3427_s0 + $0x90] sm:$0xff]  ;;  %v2310_v10 = vld [vmem:[%s3427_s0 + $0xa8] sm:$0xff] }
 0x508   :  { %2210 = vmatpush1.bf16.msra.mxu1 %v2209_v14  ;;  %v2311_v14 = vld [vmem:[%s3427_s0 + $0xa0] sm:$0xff] }
 0x509   :  { %2211 = vmatprep.subr.bf16.mxu1 %v3489_v19 }
 0x50c   :  { %v1973_v15 = vpop.f32.mrb[44].mxu1 }
 0x50d   :  { %v1228_v16 = vpop.f32.mrb[45].mxu1 }
 0x50e   :  { %v2212_v17 = vpack.c.bf16 %v1973_v15, %v1228_v16  ;;  %v2312_v15 = vld [vmem:[%s3427_s0 + $0xb8] sm:$0xff]  ;;  %v2313_v16 = vld [vmem:[%s3427_s0 + $0xb0] sm:$0xff] }
 0x510   :  { %2213 = vmatpush1.bf16.msra.mxu1 %v2212_v17  ;;  %v2314_v17 = vld [vmem:[%s3427_s0 + $0xc0] sm:$0xff] }
 0x511   :  { %2214 = vmatprep.subr.bf16.mxu1 %v3489_v19 }
 0x514   :  { %v1976_v21 = vpop.f32.mrb[46].mxu1 }
 0x515   :  { %v1238_v22 = vpop.f32.mrb[47].mxu1 }
 0x516   :  { %v2215_v23 = vpack.c.bf16 %v1976_v21, %v1238_v22  ;;  %v2315_v21 = vld [vmem:[%s3427_s0 + $0xd8] sm:$0xff]  ;;  %v2316_v22 = vld [vmem:[%s3427_s0 + $0xd0] sm:$0xff] }
 0x518   :  { %2216 = vmatpush1.bf16.msra.mxu1 %v2215_v23  ;;  %v2317_v23 = vld [vmem:[%s3427_s0 + $0xe8] sm:$0xff] }
 0x519   :  { %2217 = vmatprep.subr.bf16.mxu1 %v3489_v19 }
 0x51c   :  { %v1979_v24 = vpop.f32.mrb[48].mxu1 }
 0x51d   :  { %v1248_v26 = vpop.f32.mrb[49].mxu1 }
 0x51e   :  { %v2218_v28 = vpack.c.bf16 %v1979_v24, %v1248_v26  ;;  %v2319_v24 = vld [vmem:[%s3427_s0 + $0xf8] sm:$0xff]  ;;  %v2320_v26 = vld [vmem:[%s3427_s0 + $0xf0] sm:$0xff] }
 0x520   :  { %2219 = vmatpush1.bf16.msra.mxu1 %v2218_v28  ;;  %v2321_v28 = vld [vmem:[%s3427_s0 + $0x108] sm:$0xff] }
 0x521   :  { %2220 = vmatprep.subr.bf16.mxu1 %v3489_v19 }
 0x524   :  { %v1982_v30 = vpop.f32.mrb[50].mxu1 }
 0x525   :  { %v1258_v32 = vpop.f32.mrb[51].mxu1 }
 0x526   :  { %v2221_v34 = vpack.c.bf16 %v1982_v30, %v1258_v32  ;;  %v2322_v30 = vld [vmem:[%s3427_s0 + $0x100] sm:$0xff]  ;;  %v2323_v32 = vld [vmem:[%s3427_s0 + $0x118] sm:$0xff] }
 0x528   :  { %2222 = vmatpush1.bf16.msra.mxu1 %v2221_v34  ;;  %v2324_v34 = vld [vmem:[%s3427_s0 + $0x110] sm:$0xff] }
 0x529   :  { %2223 = vmatprep.subr.bf16.mxu1 %v3489_v19 }
 0x52c   :  { %v1985_v36 = vpop.f32.mrb[52].mxu1 }
 0x52d   :  { %v1268_v38 = vpop.f32.mrb[53].mxu1 }
 0x52e   :  { %v2224_v40 = vpack.c.bf16 %v1985_v36, %v1268_v38  ;;  %v2325_v36 = vld [vmem:[%s3427_s0 + $0x128] sm:$0xff]  ;;  %v2326_v38 = vld [vmem:[%s3427_s0 + $0x120] sm:$0xff] }
 0x530   :  { %2225 = vmatpush1.bf16.msra.mxu1 %v2224_v40  ;;  %v2327_v40 = vld [vmem:[%s3427_s0 + $0x138] sm:$0xff] }
 0x531   :  { %2226 = vmatprep.subr.bf16.mxu1 %v3489_v19 }
 0x534   :  { %v1988_v42 = vpop.f32.mrb[54].mxu1 }
 0x535   :  { %v1278_v44 = vpop.f32.mrb[55].mxu1 }
 0x536   :  { %v2227_v46 = vpack.c.bf16 %v1988_v42, %v1278_v44  ;;  %v2328_v42 = vld [vmem:[%s3427_s0 + $0x130] sm:$0xff]  ;;  %v2329_v44 = vld [vmem:[%s3427_s0 + $0x148] sm:$0xff] }
 0x538   :  { %2228 = vmatpush1.bf16.msra.mxu1 %v2227_v46  ;;  %v2330_v46 = vld [vmem:[%s3427_s0 + $0x140] sm:$0xff] }
 0x539   :  { %2229 = vmatprep.subr.bf16.mxu1 %v3489_v19 }
 0x53c   :  { %v1991_v20 = vpop.f32.mrb[56].mxu1 }
 0x53d   :  { %v1288_v62 = vpop.f32.mrb[57].mxu1 }
 0x53e   :  { %v2230_v56 = vpack.c.bf16 %v1991_v20, %v1288_v62  ;;  %v2331_v20 = vld [vmem:[%s3427_s0 + $0x158] sm:$0xff]  ;;  %v2332_v62 = vld [vmem:[%s3427_s0 + $0x150] sm:$0xff] }
 0x540   :  { %2231 = vmatpush1.bf16.msra.mxu1 %v2230_v56  ;;  %v2333_v56 = vld [vmem:[%s3427_s0 + $0x168] sm:$0xff] }
 0x541   :  { %2232 = vmatprep.subr.bf16.mxu1 %v3489_v19 }
 0x544   :  { %v1994_v33 = vpop.f32.mrb[58].mxu1 }
 0x545   :  { %v1298_v57 = vpop.f32.mrb[59].mxu1 }
 0x546   :  { %v2233_v31 = vpack.c.bf16 %v1994_v33, %v1298_v57  ;;  %v2334_v33 = vld [vmem:[%s3427_s0 + $0x160] sm:$0xff]  ;;  %v2335_v57 = vld [vmem:[%s3427_s0 + $0x178] sm:$0xff] }
 0x548   :  { %2234 = vmatpush1.bf16.msra.mxu1 %v2233_v31  ;;  %v2336_v31 = vld [vmem:[%s3427_s0 + $0x170] sm:$0xff] }
 0x549   :  { %2235 = vmatprep.subr.bf16.mxu1 %v3489_v19 }
 0x54c   :  { %v1997_v47 = vpop.f32.mrb[60].mxu1 }
 0x54d   :  { %v1308_v45 = vpop.f32.mrb[61].mxu1 }
 0x54e   :  { %v2236_v63 = vpack.c.bf16 %v1997_v47, %v1308_v45  ;;  %v2337_v47 = vld [vmem:[%s3427_s0 + $0x188] sm:$0xff]  ;;  %v2338_v45 = vld [vmem:[%s3427_s0 + $0x180] sm:$0xff] }
 0x550   :  { %2237 = vmatpush1.bf16.msra.mxu1 %v2236_v63  ;;  %v2339_v63 = vld [vmem:[%s3427_s0 + $0x198] sm:$0xff] }
 0x551   :  { %2238 = vmatprep.subr.bf16.mxu1 %v3489_v19 }
 0x554   :  { %v2000_v54 = vpop.f32.mrb[62].mxu1 }
 0x555   :  { %v1318_v43 = vpop.f32.mrb[63].mxu1 }
 0x556   :  { %v2239_v13 = vpack.c.bf16 %v2000_v54, %v1318_v43  ;;  %v2340_v54 = vld [vmem:[%s3427_s0 + $0x190] sm:$0xff]  ;;  %v2341_v43 = vld [vmem:[%s3427_s0 + $0x1a8] sm:$0xff] }
 0x558   :  { %2240 = vmatpush1.bf16.msra.mxu1 %v2239_v13  ;;  %v2342_v13 = vld [vmem:[%s3427_s0 + $0x1a0] sm:$0xff] }
 0x559   :  { %2241 = vmatprep.subr.bf16.mxu1 %v3489_v19 }
 0x55c   :  { %v2003_v18 = vpop.f32.mrb[64].mxu1 }
 0x55d   :  { %v1328_v53 = vpop.f32.mrb[65].mxu1 }
 0x55e   :  { %v2242_v6 = vpack.c.bf16 %v2003_v18, %v1328_v53  ;;  %v2343_v18 = vld [vmem:[%s3427_s0 + $0x1b8] sm:$0xff]  ;;  %v2344_v53 = vld [vmem:[%s3427_s0 + $0x1b0] sm:$0xff] }
 0x560   :  { %2243 = vmatpush1.bf16.msra.mxu1 %v2242_v6  ;;  %v2345_v6 = vld [vmem:[%s3427_s0 + $0x1c8] sm:$0xff] }
 0x561   :  { %2244 = vmatprep.subr.bf16.mxu1 %v3489_v19 }
 0x564   :  { %v2006_v25 = vpop.f32.mrb[66].mxu1 }
 0x565   :  { %v1338_v37 = vpop.f32.mrb[67].mxu1 }
 0x566   :  { %v2245_v52 = vpack.c.bf16 %v2006_v25, %v1338_v37  ;;  %v2346_v25 = vld [vmem:[%s3427_s0 + $0x1c0] sm:$0xff]  ;;  %v2347_v37 = vld [vmem:[%s3427_s0 + $0x1d8] sm:$0xff] }
 0x568   :  { %2246 = vmatpush1.bf16.msra.mxu1 %v2245_v52  ;;  %v2348_v52 = vld [vmem:[%s3427_s0 + $0x1d0] sm:$0xff] }
 0x569   :  { %2247 = vmatprep.subr.bf16.mxu1 %v3489_v19 }
 0x56c   :  { %v2009_v41 = vpop.f32.mrb[68].mxu1 }
 0x56d   :  { %v1348_v39 = vpop.f32.mrb[69].mxu1 }
 0x56e   :  { %v2248_v12 = vpack.c.bf16 %v2009_v41, %v1348_v39  ;;  %v2349_v41 = vld [vmem:[%s3427_s0 + $0x1e8] sm:$0xff]  ;;  %v2350_v39 = vld [vmem:[%s3427_s0 + $0x1e0] sm:$0xff] }
 0x570   :  { %2249 = vmatpush1.bf16.msra.mxu1 %v2248_v12  ;;  %v2351_v12 = vld [vmem:[%s3427_s0 + $0x1f8] sm:$0xff] }
 0x571   :  { %2250 = vmatprep.subr.bf16.mxu1 %v3489_v19  ;;  %v2294_v19 = vld [vmem:[%s3427_s0 + $0x28] sm:$0xff] }
 0x574   :  { %v2012_v5 = vpop.f32.mrb[70].mxu1 }
 0x575   :  { %v1358_v11 = vpop.f32.mrb[71].mxu1 }
 0x576   :  { %v2251_v61 = vpack.c.bf16 %v2012_v5, %v1358_v11  ;;  %v2352_v5 = vld [vmem:[%s3427_s0 + $0x1f0] sm:$0xff] }
 0x578   :  { %2252 = vmatpush1.bf16.msra.mxu1 %v2251_v61 }
 0x57b   :  { %1432 = vmatmul.mubr.f32.vlgmr.msra.gmra.mrb[72].mxu1 %v2291_v29 }
 0x57c   :  { %1436 = vmatprep.mubr.f32.mxu1 %v2292_v48 }
 0x57f   :  { %1437 = vmatmul.mubr.f32.gmra.mrb[74].mxu1 %v2293_v50 }
 0x580   :  { %1441 = vmatprep.mubr.f32.mxu1 %v2294_v19 }
 0x583   :  { %1442 = vmatmul.mubr.f32.gmra.mrb[76].mxu1 %v2295_v27 }
 0x584   :  { %1446 = vmatprep.mubr.f32.mxu1 %v2296_v55 }
 0x587   :  { %1447 = vmatmul.mubr.f32.gmra.mrb[78].mxu1 %v2297_v59 }
 0x588   :  { %1451 = vmatprep.mubr.f32.mxu1 %v2298_v35 }
 0x58b   :  { %1452 = vmatmul.mubr.f32.gmra.mrb[80].mxu1 %v2299_v0 }
 0x58c   :  { %1456 = vmatprep.mubr.f32.mxu1 %v2300_v2 }
 0x58f   :  { %1457 = vmatmul.mubr.f32.gmra.mrb[82].mxu1 %v2301_v4 }
 0x590   :  { %1461 = vmatprep.mubr.f32.mxu1 %v2302_v7 }
 0x593   :  { %1462 = vmatmul.mubr.f32.gmra.mrb[84].mxu1 %v2303_v49 }
 0x594   :  { %1466 = vmatprep.mubr.f32.mxu1 %v2304_v51 }
 0x597   :  { %1467 = vmatmul.mubr.f32.gmra.mrb[86].mxu1 %v2305_v58 }
 0x598   :  { %1471 = vmatprep.mubr.f32.mxu1 %v2306_v60 }
 0x59b   :  { %1472 = vmatmul.mubr.f32.gmra.mrb[88].mxu1 %v2307_v1 }
 0x59c   :  { %1476 = vmatprep.mubr.f32.mxu1 %v2308_v3 }
 0x59f   :  { %1477 = vmatmul.mubr.f32.gmra.mrb[90].mxu1 %v2309_v8 }
 0x5a0   :  { %1481 = vmatprep.mubr.f32.mxu1 %v2310_v10 }
 0x5a3   :  { %1482 = vmatmul.mubr.f32.gmra.mrb[92].mxu1 %v2311_v14 }
 0x5a4   :  { %1486 = vmatprep.mubr.f32.mxu1 %v2312_v15 }
 0x5a7   :  { %1487 = vmatmul.mubr.f32.gmra.mrb[94].mxu1 %v2313_v16 }
 0x5a8   :  { %1491 = vmatprep.mubr.f32.mxu1 %v3077_v9  ;;  %v2318_v9 = vld [vmem:[%s3427_s0 + $0xe0] sm:$0xff] }
 0x5ab   :  { %1492 = vmatmul.mubr.f32.gmra.mrb[96].mxu1 %v2314_v17 }
 0x5ac   :  { %1496 = vmatprep.mubr.f32.mxu1 %v2315_v21 }
 0x5af   :  { %1497 = vmatmul.mubr.f32.gmra.mrb[98].mxu1 %v2316_v22 }
 0x5b0   :  { %1501 = vmatprep.mubr.f32.mxu1 %v2317_v23 }
 0x5b3   :  { %1502 = vmatmul.mubr.f32.gmra.mrb[100].mxu1 %v2318_v9 }
 0x5b4   :  { %1506 = vmatprep.mubr.f32.mxu1 %v2319_v24 }
 0x5b7   :  { %1507 = vmatmul.mubr.f32.gmra.mrb[102].mxu1 %v2320_v26 }
 0x5b8   :  { %1511 = vmatprep.mubr.f32.mxu1 %v2321_v28 }
 0x5bb   :  { %1512 = vmatmul.mubr.f32.gmra.mrb[104].mxu1 %v2322_v30 }
 0x5bc   :  { %1516 = vmatprep.mubr.f32.mxu1 %v2323_v32 }
 0x5bf   :  { %1517 = vmatmul.mubr.f32.gmra.mrb[106].mxu1 %v2324_v34 }
 0x5c0   :  { %1521 = vmatprep.mubr.f32.mxu1 %v2325_v36 }
 0x5c3   :  { %1522 = vmatmul.mubr.f32.gmra.mrb[108].mxu1 %v2326_v38 }
 0x5c4   :  { %1526 = vmatprep.mubr.f32.mxu1 %v2327_v40 }
 0x5c7   :  { %1527 = vmatmul.mubr.f32.gmra.mrb[110].mxu1 %v2328_v42 }
 0x5c8   :  { %1531 = vmatprep.mubr.f32.mxu1 %v2329_v44 }
 0x5cb   :  { %1532 = vmatmul.mubr.f32.gmra.mrb[112].mxu1 %v2330_v46 }
 0x5cc   :  { %1536 = vmatprep.mubr.f32.mxu1 %v2331_v20 }
 0x5cf   :  { %1537 = vmatmul.mubr.f32.gmra.mrb[114].mxu1 %v2332_v62 }
 0x5d0   :  { %1541 = vmatprep.mubr.f32.mxu1 %v2333_v56 }
 0x5d3   :  { %1542 = vmatmul.mubr.f32.gmra.mrb[116].mxu1 %v2334_v33 }
 0x5d4   :  { %1546 = vmatprep.mubr.f32.mxu1 %v2335_v57 }
 0x5d7   :  { %1547 = vmatmul.mubr.f32.gmra.mrb[118].mxu1 %v2336_v31 }
 0x5d8   :  { %1551 = vmatprep.mubr.f32.mxu1 %v2337_v47 }
 0x5db   :  { %1552 = vmatmul.mubr.f32.gmra.mrb[120].mxu1 %v2338_v45 }
 0x5dc   :  { %1556 = vmatprep.mubr.f32.mxu1 %v2339_v63 }
 0x5df   :  { %1557 = vmatmul.mubr.f32.gmra.mrb[122].mxu1 %v2340_v54 }
 0x5e0   :  { %1561 = vmatprep.mubr.f32.mxu1 %v2341_v43 }
 0x5e3   :  { %1562 = vmatmul.mubr.f32.gmra.mrb[124].mxu1 %v2342_v13 }
 0x5e4   :  { %1566 = vmatprep.mubr.f32.mxu1 %v2343_v18 }
 0x5e7   :  { %1567 = vmatmul.mubr.f32.gmra.mrb[126].mxu1 %v2344_v53 }
 0x5e8   :  { %1571 = vmatprep.mubr.f32.mxu1 %v2345_v6 }
 0x5eb   :  { %1572 = vmatmul.mubr.f32.gmra.mrb[128].mxu1 %v2346_v25 }
 0x5ec   :  { %1576 = vmatprep.mubr.f32.mxu1 %v2347_v37 }
 0x5ef   :  { %1577 = vmatmul.mubr.f32.gmra.mrb[130].mxu1 %v2348_v52 }
 0x5f0   :  { %1581 = vmatprep.mubr.f32.mxu1 %v2349_v41 }
 0x5f3   :  { %1582 = vmatmul.mubr.f32.gmra.mrb[132].mxu1 %v2350_v39 }
 0x5f4   :  { %1586 = vmatprep.mubr.f32.mxu1 %v2351_v12 }
 0x5f7   :  { %1587 = vmatmul.mubr.f32.gmra.mrb[134].mxu1 %v2352_v5 }
 0x64e   :  { %v1433_v11 = vpop.f32.mrb[72].mxu1 }
 0x64f   :  { %1592 = vst [vmem:[%s3432_s5] sm:$0xff] %v1433_v11  ;;  %v1435_v61 = vpop.f32.mrb[73].mxu1 }
 0x652   :  { %v1438_v29 = vpop.f32.mrb[74].mxu1 }
 0x653   :  { %1593 = vst [vmem:[%s3432_s5 + $0x8] sm:$0xff] %v1438_v29  ;;  %v1440_v48 = vpop.f32.mrb[75].mxu1 }
 0x656   :  { %v1443_v50 = vpop.f32.mrb[76].mxu1 }
 0x657   :  { %1594 = vst [vmem:[%s3432_s5 + $0x10] sm:$0xff] %v1443_v50  ;;  %v1445_v19 = vpop.f32.mrb[77].mxu1 }
 0x65a   :  { %v1448_v27 = vpop.f32.mrb[78].mxu1 }
 0x65b   :  { %1595 = vst [vmem:[%s3432_s5 + $0x18] sm:$0xff] %v1448_v27  ;;  %v1450_v55 = vpop.f32.mrb[79].mxu1 }
 0x65e   :  { %v1453_v59 = vpop.f32.mrb[80].mxu1 }
 0x65f   :  { %1596 = vst [vmem:[%s3432_s5 + $0x20] sm:$0xff] %v1453_v59  ;;  %v1455_v35 = vpop.f32.mrb[81].mxu1 }
 0x662   :  { %v1458_v0 = vpop.f32.mrb[82].mxu1 }
 0x663   :  { %1597 = vst [vmem:[%s3432_s5 + $0x28] sm:$0xff] %v1458_v0  ;;  %v1460_v2 = vpop.f32.mrb[83].mxu1 }
 0x666   :  { %v1463_v4 = vpop.f32.mrb[84].mxu1 }
 0x667   :  { %1598 = vst [vmem:[%s3432_s5 + $0x30] sm:$0xff] %v1463_v4  ;;  %v1465_v7 = vpop.f32.mrb[85].mxu1 }
 0x66a   :  { %v1468_v49 = vpop.f32.mrb[86].mxu1 }
 0x66b   :  { %1599 = vst [vmem:[%s3432_s5 + $0x38] sm:$0xff] %v1468_v49  ;;  %v1470_v51 = vpop.f32.mrb[87].mxu1 }
 0x66e   :  { %v1473_v58 = vpop.f32.mrb[88].mxu1 }
 0x66f   :  { %1600 = vst [vmem:[%s3432_s5 + $0x40] sm:$0xff] %v1473_v58  ;;  %v1475_v60 = vpop.f32.mrb[89].mxu1 }
 0x672   :  { %v1478_v1 = vpop.f32.mrb[90].mxu1 }
 0x673   :  { %1601 = vst [vmem:[%s3432_s5 + $0x48] sm:$0xff] %v1478_v1  ;;  %v1480_v3 = vpop.f32.mrb[91].mxu1 }
 0x676   :  { %v1483_v8 = vpop.f32.mrb[92].mxu1 }
 0x677   :  { %1602 = vst [vmem:[%s3432_s5 + $0x50] sm:$0xff] %v1483_v8  ;;  %v1485_v10 = vpop.f32.mrb[93].mxu1 }
 0x67a   :  { %v1488_v14 = vpop.f32.mrb[94].mxu1 }
 0x67b   :  { %1603 = vst [vmem:[%s3432_s5 + $0x58] sm:$0xff] %v1488_v14  ;;  %v1490_v15 = vpop.f32.mrb[95].mxu1 }
 0x67e   :  { %v1493_v16 = vpop.f32.mrb[96].mxu1 }
 0x67f   :  { %1604 = vst [vmem:[%s3432_s5 + $0x60] sm:$0xff] %v1493_v16  ;;  %v1495_v17 = vpop.f32.mrb[97].mxu1 }
 0x682   :  { %v1498_v21 = vpop.f32.mrb[98].mxu1 }
 0x683   :  { %1605 = vst [vmem:[%s3432_s5 + $0x68] sm:$0xff] %v1498_v21  ;;  %v1500_v22 = vpop.f32.mrb[99].mxu1 }
 0x686   :  { %v1503_v23 = vpop.f32.mrb[100].mxu1 }
 0x687   :  { %1606 = vst [vmem:[%s3432_s5 + $0x70] sm:$0xff] %v1503_v23  ;;  %v1505_v9 = vpop.f32.mrb[101].mxu1 }
 0x68a   :  { %v1508_v24 = vpop.f32.mrb[102].mxu1 }
 0x68b   :  { %1607 = vst [vmem:[%s3432_s5 + $0x78] sm:$0xff] %v1508_v24  ;;  %v1510_v26 = vpop.f32.mrb[103].mxu1 }
 0x68e   :  { %v1513_v28 = vpop.f32.mrb[104].mxu1 }
 0x68f   :  { %1608 = vst [vmem:[%s3432_s5 + $0x80] sm:$0xff] %v1513_v28  ;;  %v1515_v30 = vpop.f32.mrb[105].mxu1 }
 0x692   :  { %v1518_v32 = vpop.f32.mrb[106].mxu1 }
 0x693   :  { %1609 = vst [vmem:[%s3432_s5 + $0x88] sm:$0xff] %v1518_v32  ;;  %v1520_v34 = vpop.f32.mrb[107].mxu1 }
 0x696   :  { %v1523_v36 = vpop.f32.mrb[108].mxu1 }
 0x697   :  { %1610 = vst [vmem:[%s3432_s5 + $0x90] sm:$0xff] %v1523_v36  ;;  %v1525_v38 = vpop.f32.mrb[109].mxu1 }
 0x69a   :  { %v1528_v40 = vpop.f32.mrb[110].mxu1 }
 0x69b   :  { %1611 = vst [vmem:[%s3432_s5 + $0x98] sm:$0xff] %v1528_v40  ;;  %v1530_v42 = vpop.f32.mrb[111].mxu1 }
 0x69e   :  { %v1533_v44 = vpop.f32.mrb[112].mxu1 }
 0x69f   :  { %1612 = vst [vmem:[%s3432_s5 + $0xa0] sm:$0xff] %v1533_v44  ;;  %v1535_v46 = vpop.f32.mrb[113].mxu1 }
 0x6a2   :  { %v1538_v20 = vpop.f32.mrb[114].mxu1 }
 0x6a3   :  { %1613 = vst [vmem:[%s3432_s5 + $0xa8] sm:$0xff] %v1538_v20  ;;  %v1540_v62 = vpop.f32.mrb[115].mxu1 }
 0x6a6   :  { %v1543_v56 = vpop.f32.mrb[116].mxu1 }
 0x6a7   :  { %1614 = vst [vmem:[%s3432_s5 + $0xb0] sm:$0xff] %v1543_v56  ;;  %v1545_v33 = vpop.f32.mrb[117].mxu1 }
 0x6aa   :  { %v1548_v57 = vpop.f32.mrb[118].mxu1 }
 0x6ab   :  { %1615 = vst [vmem:[%s3432_s5 + $0xb8] sm:$0xff] %v1548_v57  ;;  %v1550_v31 = vpop.f32.mrb[119].mxu1 }
 0x6ae   :  { %v1553_v47 = vpop.f32.mrb[120].mxu1 }
 0x6af   :  { %1616 = vst [vmem:[%s3432_s5 + $0xc0] sm:$0xff] %v1553_v47  ;;  %v1555_v45 = vpop.f32.mrb[121].mxu1 }
 0x6b2   :  { %v1558_v63 = vpop.f32.mrb[122].mxu1 }
 0x6b3   :  { %1617 = vst [vmem:[%s3432_s5 + $0xc8] sm:$0xff] %v1558_v63  ;;  %v1560_v54 = vpop.f32.mrb[123].mxu1 }
 0x6b6   :  { %v1563_v43 = vpop.f32.mrb[124].mxu1 }
 0x6b7   :  { %1618 = vst [vmem:[%s3432_s5 + $0xd0] sm:$0xff] %v1563_v43  ;;  %v1565_v13 = vpop.f32.mrb[125].mxu1 }
 0x6ba   :  { %v1568_v18 = vpop.f32.mrb[126].mxu1 }
 0x6bb   :  { %1619 = vst [vmem:[%s3432_s5 + $0xd8] sm:$0xff] %v1568_v18  ;;  %v1570_v53 = vpop.f32.mrb[127].mxu1 }
 0x6be   :  { %v1573_v6 = vpop.f32.mrb[128].mxu1 }
 0x6bf   :  { %1620 = vst [vmem:[%s3432_s5 + $0xe0] sm:$0xff] %v1573_v6  ;;  %v1575_v25 = vpop.f32.mrb[129].mxu1 }
 0x6c2   :  { %v1578_v37 = vpop.f32.mrb[130].mxu1 }
 0x6c3   :  { %1621 = vst [vmem:[%s3432_s5 + $0xe8] sm:$0xff] %v1578_v37  ;;  %v1580_v52 = vpop.f32.mrb[131].mxu1 }
 0x6c6   :  { %v1583_v41 = vpop.f32.mrb[132].mxu1 }
 0x6c7   :  { %1622 = vst [vmem:[%s3432_s5 + $0xf0] sm:$0xff] %v1583_v41  ;;  %v1585_v39 = vpop.f32.mrb[133].mxu1 }
 0x6ca   :  { %v1588_v12 = vpop.f32.mrb[134].mxu1 }
 0x6cb   :  { %1623 = vst [vmem:[%s3432_s5 + $0xf8] sm:$0xff] %v1588_v12  ;;  %v1590_v5 = vpop.f32.mrb[135].mxu1 }
 0x6cc   :  { %1628 = vsyncpa [#allocation3], 1 }

</bundles_post_ra>
